<compile_context>
chip_gen: v7x
topology: tpu7x:2x2x1
jax: 0.10.0
libtpu: 0.0.40
codegen_flags: <defaults>
</compile_context>

<pallas_src>
import functools

import jax
import jax.numpy as jnp
from jax import lax
from jax.experimental import pallas as pl
from jax.experimental.pallas import tpu as pltpu

EPS = 1e-5
LANE = 128


def _round_up(x, m):
    return (x + m - 1) // m * m


def _pad_axis(a, axis, target):
    if a.shape[axis] == target:
        return a
    pad = [(0, 0)] * a.ndim
    pad[axis] = (0, target - a.shape[axis])
    return jnp.pad(a, pad)


def _pad_rows(x2d, tile_m):
    """Pad rows so M is a multiple of the (per-stage) tile size."""
    m = x2d.shape[0]
    tile = min(tile_m, _round_up(m, 8))
    mp = _round_up(m, tile)
    if mp != m:
        x2d = jnp.pad(x2d, ((0, mp - m), (0, 0)))
    return x2d, tile


# ----------------------------------------------------------------------------
# Kernel bodies
# ----------------------------------------------------------------------------
def _conv_stats_kernel(x_ref, w_ref, y_ref, psum_ref, psq_ref):
    """y = x @ w; also emit per-tile per-channel sum / sum-of-squares partials."""
    y = jnp.dot(x_ref[...].astype(w_ref.dtype), w_ref[...],
                preferred_element_type=jnp.float32)
    y_ref[...] = y
    psum_ref[...] = jnp.broadcast_to(jnp.sum(y, axis=0, keepdims=True),
                                     psum_ref.shape)
    psq_ref[...] = jnp.broadcast_to(jnp.sum(y * y, axis=0, keepdims=True),
                                    psq_ref.shape)


def _bnrelu_conv_stats_kernel(x_ref, scale_ref, shift_ref, w_ref,
                              y_ref, psum_ref, psq_ref, *, tile_m, true_m):
    """a = relu(x*scale + shift); y = a @ w; emit stats partials (fused BN+conv)."""
    a = jnp.maximum(x_ref[...] * scale_ref[...] + shift_ref[...], 0.0)
    if true_m % tile_m != 0:
        # Zero out padded rows so the BN statistics stay exact.
        rows = lax.broadcasted_iota(jnp.int32, a.shape, 0) + pl.program_id(0) * tile_m
        a = jnp.where(rows < true_m, a, 0.0)
    y = jnp.dot(a.astype(w_ref.dtype), w_ref[...],
                preferred_element_type=jnp.float32)
    y_ref[...] = y
    psum_ref[...] = jnp.broadcast_to(jnp.sum(y, axis=0, keepdims=True),
                                     psum_ref.shape)
    psq_ref[...] = jnp.broadcast_to(jnp.sum(y * y, axis=0, keepdims=True),
                                    psq_ref.shape)


def _bn_apply_kernel(y_ref, scale_ref, shift_ref, o_ref, *, relu):
    y = y_ref[...] * scale_ref[...] + shift_ref[...]
    if relu:
        y = jnp.maximum(y, 0.0)
    o_ref[...] = y.astype(o_ref.dtype)


# ----------------------------------------------------------------------------
# pallas_call wrappers
# ----------------------------------------------------------------------------
def _conv_stats_call(x2d, w, *, tile_m, scale=None, shift=None, true_m=None):
    mp, k = x2d.shape
    cout = w.shape[1]
    g = mp // tile_m
    out_shape = (jax.ShapeDtypeStruct((mp, cout), jnp.float32),
                 jax.ShapeDtypeStruct((8 * g, cout), jnp.float32),
                 jax.ShapeDtypeStruct((8 * g, cout), jnp.float32))
    out_specs = (pl.BlockSpec((tile_m, cout), lambda i: (i, 0)),
                 pl.BlockSpec((8, cout), lambda i: (i, 0)),
                 pl.BlockSpec((8, cout), lambda i: (i, 0)))
    if scale is None:
        kernel = _conv_stats_kernel
        in_specs = [pl.BlockSpec((tile_m, k), lambda i: (i, 0)),
                    pl.BlockSpec((k, cout), lambda i: (0, 0))]
        args = (x2d, w)
    else:
        kernel = functools.partial(_bnrelu_conv_stats_kernel, tile_m=tile_m,
                                   true_m=true_m if true_m is not None else mp)
        in_specs = [pl.BlockSpec((tile_m, k), lambda i: (i, 0)),
                    pl.BlockSpec((1, k), lambda i: (0, 0)),
                    pl.BlockSpec((1, k), lambda i: (0, 0)),
                    pl.BlockSpec((k, cout), lambda i: (0, 0))]
        args = (x2d, scale.reshape(1, k), shift.reshape(1, k), w)

    y, psum, psq = pl.pallas_call(
        kernel,
        out_shape=out_shape,
        grid=(g,),
        in_specs=in_specs,
        out_specs=out_specs,
        compiler_params=pltpu.CompilerParams(dimension_semantics=("parallel",)),
    )(*args)
    ysum = psum.reshape(g, 8, cout)[:, 0, :].sum(axis=0)
    ysq = psq.reshape(g, 8, cout)[:, 0, :].sum(axis=0)
    return y, ysum, ysq


def _bn_apply_call(y2d, scale, shift, *, tile_m, relu):
    mp, c = y2d.shape
    g = mp // tile_m
    return pl.pallas_call(
        functools.partial(_bn_apply_kernel, relu=relu),
        out_shape=jax.ShapeDtypeStruct((mp, c), jnp.float32),
        grid=(g,),
        in_specs=[pl.BlockSpec((tile_m, c), lambda i: (i, 0)),
                  pl.BlockSpec((1, c), lambda i: (0, 0)),
                  pl.BlockSpec((1, c), lambda i: (0, 0))],
        out_specs=pl.BlockSpec((tile_m, c), lambda i: (i, 0)),
        compiler_params=pltpu.CompilerParams(dimension_semantics=("parallel",)),
    )(y2d, scale.reshape(1, c), shift.reshape(1, c))


def _bn_scale_shift(ysum, ysq, count, gamma, beta):
    """Fold batch stats + gamma/beta into a per-channel affine (scale, shift)."""
    mean = ysum / count
    var = jnp.maximum(ysq / count - mean * mean, 0.0)   # biased, as BatchNorm
    scale = gamma * lax.rsqrt(var + EPS)
    shift = beta - mean * scale
    return scale, shift


# ----------------------------------------------------------------------------
# Bottleneck forward (layout plumbing: NCHW<->NHWC, channel padding, im2col)
# ----------------------------------------------------------------------------
def bottleneck_forward(x_nchw, kp, *, stride, groups, out_channels, tile_m=256):
    del groups  # groups are baked into the block-diagonal w2
    cp_in = kp["w1"].shape[0]
    cp_w = kp["w1"].shape[1]
    cp_out = kp["w3"].shape[1]

    x = jnp.transpose(x_nchw, (0, 2, 3, 1)).astype(jnp.float32)   # NCHW -> NHWC
    n, h, w, _ = x.shape
    x = _pad_axis(x, 3, cp_in)                                    # lane-dense channels

    # ---- cna1: 1x1 conv + BN(batch stats) + ReLU (two-pass BN) ----
    m1 = n * h * w
    x2d, tile1 = _pad_rows(x.reshape(m1, cp_in), tile_m)
    y1, s1, q1 = _conv_stats_call(x2d, kp["w1"], tile_m=tile1)
    sc1, sh1 = _bn_scale_shift(s1, q1, m1, kp["g1"], kp["b1"])
    a1 = _bn_apply_call(y1, sc1, sh1, tile_m=tile1, relu=True)[:m1]

    # ---- cna2: 3x3 grouped conv (stride, pad=1) + BN + ReLU ----
    # Lane-dense im2col produced once: [M2, 9*Cp]; grouped weights are a
    # block-diagonal [9*Cp, Cp] matrix -> single big-K matmul on the MXU.
    # TODO(synk): for very large activations, stream the 9 shifted windows via
    # manual DMA instead of materializing the im2col slab in HBM.
    a1 = a1.reshape(n, h, w, cp_w)
    a1p = jnp.pad(a1, ((0, 0), (1, 1), (1, 1), (0, 0)))
    ho = (h + 2 - 3) // stride + 1
    wo = (w + 2 - 3) // stride + 1
    taps = [lax.slice(a1p, (0, kh, kw, 0),
                      (n, kh + (ho - 1) * stride + 1,
                       kw + (wo - 1) * stride + 1, cp_w),
                      (1, stride, stride, 1))
            for kh in range(3) for kw in range(3)]
    taps = jnp.concatenate(taps, axis=-1).reshape(n * ho * wo, 9 * cp_w)
    m2 = n * ho * wo
    taps, tile2 = _pad_rows(taps, tile_m)
    y2, s2, q2 = _conv_stats_call(taps, kp["w2"], tile_m=tile2)
    sc2, sh2 = _bn_scale_shift(s2, q2, m2, kp["g2"], kp["b2"])

    # ---- cn3: BN2+ReLU fused into the 1x1 conv + stats, then BN3 (no act) ----
    y3, s3, q3 = _conv_stats_call(y2, kp["w3"], tile_m=tile2,
                                  scale=sc2, shift=sh2, true_m=m2)
    sc3, sh3 = _bn_scale_shift(s3, q3, m2, kp["g3"], kp["b3"])
    out = _bn_apply_call(y3, sc3, sh3, tile_m=tile2, relu=False)[:m2]

    out = out.reshape(n, ho, wo, cp_out)[..., :out_channels]
    return jnp.transpose(out, (0, 3, 1, 2))                       # NHWC -> NCHW


# ----------------------------------------------------------------------------
# Parameter prep: pad channels to lane multiples, build block-diagonal grouped
# weights, transpose 1x1 weights to [Cin, Cout].
# ----------------------------------------------------------------------------
def prepare_kernel_params(oihw, groups, compute_dtype=jnp.float32):
    (w1, g1, b1), (w2, g2, b2), (w3, g3, b3) = oihw
    width, inplane = w1.shape[0], w1.shape[1]
    cout = w3.shape[0]
    cp_in = _round_up(inplane, LANE)
    cp_w = _round_up(width, LANE)
    cp_out = _round_up(cout, LANE)

    w1m = _pad_axis(_pad_axis(w1[:, :, 0, 0].T, 0, cp_in), 1, cp_w)

    cgi = w2.shape[1]            # input channels per group
    cgo = width // groups        # output channels per group
    wt = jnp.transpose(w2, (2, 3, 1, 0)).reshape(9, cgi, width)   # [tap, ci_local, co]
    w_full = jnp.zeros((9, cp_w, cp_w), jnp.float32)
    for g in range(groups):
        w_full = w_full.at[:, g * cgi:(g + 1) * cgi,
                           g * cgo:(g + 1) * cgo].set(wt[:, :, g * cgo:(g + 1) * cgo])
    w2m = w_full.reshape(9 * cp_w, cp_w)          # block-diagonal grouped weights

    w3m = _pad_axis(_pad_axis(w3[:, :, 0, 0].T, 0, cp_w), 1, cp_out)

    return {
        "w1": w1m.astype(compute_dtype),
        "w2": w2m.astype(compute_dtype),
        "w3": w3m.astype(compute_dtype),
        "g1": _pad_axis(g1, 0, cp_w), "b1": _pad_axis(b1, 0, cp_w),
        "g2": _pad_axis(g2, 0, cp_w), "b2": _pad_axis(b2, 0, cp_w),
        "g3": _pad_axis(g3, 0, cp_out), "b3": _pad_axis(b3, 0, cp_out),
    }


# ----------------------------------------------------------------------------
# Deterministic init (shapes follow the PyTorch __init__) + pure-JAX reference
# ----------------------------------------------------------------------------
def init_oihw_params(key, inplane, plane, group, base_width=64):
    expansion = 4
    width = int(plane * (base_width / 64.0)) * group
    ks = jax.random.split(key, 9)
    w1 = 0.1 * jax.random.normal(ks[0], (width, inplane, 1, 1), jnp.float32)
    w2 = 0.1 * jax.random.normal(ks[1], (width, width // group, 3, 3), jnp.float32)
    w3 = 0.1 * jax.random.normal(ks[2], (plane * expansion, width, 1, 1), jnp.float32)
    g1 = jax.random.uniform(ks[3], (width,), jnp.float32, 0.5, 1.5)
    b1 = 0.1 * jax.random.normal(ks[4], (width,), jnp.float32)
    g2 = jax.random.uniform(ks[5], (width,), jnp.float32, 0.5, 1.5)
    b2 = 0.1 * jax.random.normal(ks[6], (width,), jnp.float32)
    g3 = jax.random.uniform(ks[7], (plane * expansion,), jnp.float32, 0.5, 1.5)
    b3 = 0.1 * jax.random.normal(ks[8], (plane * expansion,), jnp.float32)
    return ((w1, g1, b1), (w2, g2, b2), (w3, g3, b3))


def _bn_train(x_nchw, gamma, beta):
    mean = jnp.mean(x_nchw, axis=(0, 2, 3), keepdims=True)
    var = jnp.mean((x_nchw - mean) ** 2, axis=(0, 2, 3), keepdims=True)
    y = (x_nchw - mean) * lax.rsqrt(var + EPS)
    return y * gamma.reshape(1, -1, 1, 1) + beta.reshape(1, -1, 1, 1)


def reference_forward(x, oihw, *, stride, groups):
    (w1, g1, b1), (w2, g2, b2), (w3, g3, b3) = oihw
    dn = ("NCHW", "OIHW", "NCHW")
    y = lax.conv_general_dilated(x, w1, (1, 1), "VALID", dimension_numbers=dn)
    y = jax.nn.relu(_bn_train(y, g1, b1))
    y = lax.conv_general_dilated(y, w2, (stride, stride), ((1, 1), (1, 1)),
                                 dimension_numbers=dn, feature_group_count=groups)
    y = jax.nn.relu(_bn_train(y, g2, b2))
    y = lax.conv_general_dilated(y, w3, (1, 1), "VALID", dimension_numbers=dn)
    return _bn_train(y, g3, b3)


if __name__ == "__main__":
    # inplane=8, plane=8, group=2, base_width=64 -> width=16, out channels=32
    N, inplane, H, W = 2, 8, 16, 16
    plane, group, stride = 8, 2, 2
    out_channels = plane * 4

    key = jax.random.PRNGKey(0)
    kx, kw = jax.random.split(key)
    x = jax.random.normal(kx, (N, inplane, H, W), jnp.float32)
    oihw = init_oihw_params(kw, inplane, plane, group)
    kparams = prepare_kernel_params(oihw, groups=group)   # f32; pass bf16 for MXU speed

    fwd = jax.jit(functools.partial(bottleneck_forward, stride=stride,
                                    groups=group, out_channels=out_channels,
                                    tile_m=64))
    out = jax.block_until_ready(fwd(x, kparams))

    Ho = (H + 2 - 3) // stride + 1
    Wo = (W + 2 - 3) // stride + 1
    assert out.shape == (N, out_channels, Ho, Wo), out.shape

    ref = reference_forward(x, oihw, stride=stride, groups=group)
    max_err = float(jnp.max(jnp.abs(out - ref)))
    assert max_err < 5e-3, f"max abs error vs reference = {max_err}"

    print("KERNEL_OK")
</pallas_src>

<mosaic_0001>
module attributes {stable_mosaic.version = 11 : i64} {
  func.func @_conv_stats_kernel(%arg0: i32, %arg1: memref<64x128xf32, #tpu.memory_space<vmem>>, %arg2: memref<128x128xf32, #tpu.memory_space<vmem>>, %arg3: memref<64x128xf32, #tpu.memory_space<vmem>>, %arg4: memref<8x128xf32, #tpu.memory_space<vmem>>, %arg5: memref<8x128xf32, #tpu.memory_space<vmem>>) attributes {dimension_semantics = [#tpu.dimension_semantics<parallel>], iteration_bounds = array<i64: 8>, scalar_prefetch = 0 : i64, scratch_operands = 0 : i64, tpu.core_type = #tpu.core_type<tc>, window_params = [{transform_indices = @transform_0, window_bounds = array<i64: 64, 128>}, {pipeline_mode = #tpu.pipeline_mode<synchronous>, transform_indices = @transform_1, window_bounds = array<i64: 128, 128>}, {transform_indices = @transform_2, window_bounds = array<i64: 64, 128>}, {transform_indices = @transform_3, window_bounds = array<i64: 8, 128>}, {transform_indices = @transform_4, window_bounds = array<i64: 8, 128>}]} {
    %c0 = arith.constant 0 : index
    %c0_0 = arith.constant 0 : index
    %0 = vector.load %arg1[%c0, %c0_0] : memref<64x128xf32, #tpu.memory_space<vmem>>, vector<64x128xf32>
    %c0_1 = arith.constant 0 : index
    %c0_2 = arith.constant 0 : index
    %1 = vector.load %arg2[%c0_1, %c0_2] : memref<128x128xf32, #tpu.memory_space<vmem>>, vector<128x128xf32>
    %cst = arith.constant dense<0.000000e+00> : vector<64x128xf32>
    %2 = tpu.matmul %0, %1, %cst {dimension_numbers = #tpu.dot_dimension_numbers<[1], [0], [0], [1], [0, 0, 1, 1], [], []>} : vector<64x128xf32>, vector<128x128xf32>, vector<64x128xf32> -> vector<64x128xf32>
    %c0_3 = arith.constant 0 : index
    %c0_4 = arith.constant 0 : index
    %3 = vector.load %arg3[%c0_3, %c0_4] : memref<64x128xf32, #tpu.memory_space<vmem>>, vector<64x128xf32>
    tpu.vector_store %arg3[%c0_3, %c0_4], %2 {strides = array<i32>} : memref<64x128xf32, #tpu.memory_space<vmem>>, vector<64x128xf32>,
    %cst_5 = arith.constant dense<0.000000e+00> : vector<128xf32>
    %4 = vector.multi_reduction <add>, %2, %cst_5 [0] : vector<64x128xf32> to vector<128xf32>
    %5 = vector.shape_cast %4 : vector<128xf32> to vector<1x128xf32>
    %6 = vector.shape_cast %5 : vector<1x128xf32> to vector<1x128xf32>
    %7 = vector.broadcast %6 : vector<1x128xf32> to vector<8x128xf32>
    %c0_6 = arith.constant 0 : index
    %c0_7 = arith.constant 0 : index
    %8 = vector.load %arg4[%c0_6, %c0_7] : memref<8x128xf32, #tpu.memory_space<vmem>>, vector<8x128xf32>
    tpu.vector_store %arg4[%c0_6, %c0_7], %7 {strides = array<i32>} : memref<8x128xf32, #tpu.memory_space<vmem>>, vector<8x128xf32>,
    %9 = arith.mulf %2, %2 : vector<64x128xf32>
    %cst_8 = arith.constant dense<0.000000e+00> : vector<128xf32>
    %10 = vector.multi_reduction <add>, %9, %cst_8 [0] : vector<64x128xf32> to vector<128xf32>
    %11 = vector.shape_cast %10 : vector<128xf32> to vector<1x128xf32>
    %12 = vector.shape_cast %11 : vector<1x128xf32> to vector<1x128xf32>
    %13 = vector.broadcast %12 : vector<1x128xf32> to vector<8x128xf32>
    %c0_9 = arith.constant 0 : index
    %c0_10 = arith.constant 0 : index
    %14 = vector.load %arg5[%c0_9, %c0_10] : memref<8x128xf32, #tpu.memory_space<vmem>>, vector<8x128xf32>
    tpu.vector_store %arg5[%c0_9, %c0_10], %13 {strides = array<i32>} : memref<8x128xf32, #tpu.memory_space<vmem>>, vector<8x128xf32>,
    return
  }
  func.func @transform_0(%arg0: i32) -> (i32, i32) {
    %c0_i32 = arith.constant 0 : i32
    %c0_i32_0 = arith.constant 0 : i32
    return %arg0, %c0_i32 : i32, i32
  }
  func.func @transform_1(%arg0: i32) -> (i32, i32) {
    %c0_i32 = arith.constant 0 : i32
    %c0_i32_0 = arith.constant 0 : i32
    %c0_i32_1 = arith.constant 0 : i32
    return %c0_i32, %c0_i32_0 : i32, i32
  }
  func.func @transform_2(%arg0: i32) -> (i32, i32) {
    %c0_i32 = arith.constant 0 : i32
    %c0_i32_0 = arith.constant 0 : i32
    return %arg0, %c0_i32 : i32, i32
  }
  func.func @transform_3(%arg0: i32) -> (i32, i32) {
    %c0_i32 = arith.constant 0 : i32
    %c0_i32_0 = arith.constant 0 : i32
    return %arg0, %c0_i32 : i32, i32
  }
  func.func @transform_4(%arg0: i32) -> (i32, i32) {
    %c0_i32 = arith.constant 0 : i32
    %c0_i32_0 = arith.constant 0 : i32
    return %arg0, %c0_i32 : i32, i32
  }
}

module attributes {stable_mosaic.version = 11 : i64} {
  func.func @_bn_apply_kernel(%arg0: i32, %arg1: memref<64x128xf32, #tpu.memory_space<vmem>>, %arg2: memref<1x128xf32, #tpu.memory_space<vmem>>, %arg3: memref<1x128xf32, #tpu.memory_space<vmem>>, %arg4: memref<64x128xf32, #tpu.memory_space<vmem>>) attributes {dimension_semantics = [#tpu.dimension_semantics<parallel>], iteration_bounds = array<i64: 8>, scalar_prefetch = 0 : i64, scratch_operands = 0 : i64, tpu.core_type = #tpu.core_type<tc>, window_params = [{transform_indices = @transform_0, window_bounds = array<i64: 64, 128>}, {pipeline_mode = #tpu.pipeline_mode<synchronous>, transform_indices = @transform_1, window_bounds = array<i64: 1, 128>}, {pipeline_mode = #tpu.pipeline_mode<synchronous>, transform_indices = @transform_2, window_bounds = array<i64: 1, 128>}, {transform_indices = @transform_3, window_bounds = array<i64: 64, 128>}]} {
    %c0 = arith.constant 0 : index
    %c0_0 = arith.constant 0 : index
    %0 = vector.load %arg1[%c0, %c0_0] : memref<64x128xf32, #tpu.memory_space<vmem>>, vector<64x128xf32>
    %c0_1 = arith.constant 0 : index
    %c0_2 = arith.constant 0 : index
    %1 = vector.load %arg2[%c0_1, %c0_2] : memref<1x128xf32, #tpu.memory_space<vmem>>, vector<1x128xf32>
    %2 = vector.broadcast %1 : vector<1x128xf32> to vector<64x128xf32>
    %3 = arith.mulf %0, %2 : vector<64x128xf32>
    %c0_3 = arith.constant 0 : index
    %c0_4 = arith.constant 0 : index
    %4 = vector.load %arg3[%c0_3, %c0_4] : memref<1x128xf32, #tpu.memory_space<vmem>>, vector<1x128xf32>
    %5 = vector.broadcast %4 : vector<1x128xf32> to vector<64x128xf32>
    %6 = arith.addf %3, %5 : vector<64x128xf32>
    %cst = arith.constant 0.000000e+00 : f32
    %7 = vector.broadcast %cst : f32 to vector<64x128xf32>
    %8 = arith.maximumf %6, %7 : vector<64x128xf32>
    %c0_5 = arith.constant 0 : index
    %c0_6 = arith.constant 0 : index
    %9 = vector.load %arg4[%c0_5, %c0_6] : memref<64x128xf32, #tpu.memory_space<vmem>>, vector<64x128xf32>
    tpu.vector_store %arg4[%c0_5, %c0_6], %8 {strides = array<i32>} : memref<64x128xf32, #tpu.memory_space<vmem>>, vector<64x128xf32>,
    return
  }
  func.func @transform_0(%arg0: i32) -> (i32, i32) {
    %c0_i32 = arith.constant 0 : i32
    %c0_i32_0 = arith.constant 0 : i32
    return %arg0, %c0_i32 : i32, i32
  }
  func.func @transform_1(%arg0: i32) -> (i32, i32) {
    %c0_i32 = arith.constant 0 : i32
    %c0_i32_0 = arith.constant 0 : i32
    %c0_i32_1 = arith.constant 0 : i32
    return %c0_i32, %c0_i32_0 : i32, i32
  }
  func.func @transform_2(%arg0: i32) -> (i32, i32) {
    %c0_i32 = arith.constant 0 : i32
    %c0_i32_0 = arith.constant 0 : i32
    %c0_i32_1 = arith.constant 0 : i32
    return %c0_i32, %c0_i32_0 : i32, i32
  }
  func.func @transform_3(%arg0: i32) -> (i32, i32) {
    %c0_i32 = arith.constant 0 : i32
    %c0_i32_0 = arith.constant 0 : i32
    return %arg0, %c0_i32 : i32, i32
  }
}

module attributes {stable_mosaic.version = 11 : i64} {
  func.func @_bnrelu_conv_stats_kernel(%arg0: i32, %arg1: memref<64x128xf32, #tpu.memory_space<vmem>>, %arg2: memref<1x128xf32, #tpu.memory_space<vmem>>, %arg3: memref<1x128xf32, #tpu.memory_space<vmem>>, %arg4: memref<128x128xf32, #tpu.memory_space<vmem>>, %arg5: memref<64x128xf32, #tpu.memory_space<vmem>>, %arg6: memref<8x128xf32, #tpu.memory_space<vmem>>, %arg7: memref<8x128xf32, #tpu.memory_space<vmem>>) attributes {dimension_semantics = [#tpu.dimension_semantics<parallel>], iteration_bounds = array<i64: 2>, scalar_prefetch = 0 : i64, scratch_operands = 0 : i64, tpu.core_type = #tpu.core_type<tc>, window_params = [{transform_indices = @transform_0, window_bounds = array<i64: 64, 128>}, {pipeline_mode = #tpu.pipeline_mode<synchronous>, transform_indices = @transform_1, window_bounds = array<i64: 1, 128>}, {pipeline_mode = #tpu.pipeline_mode<synchronous>, transform_indices = @transform_2, window_bounds = array<i64: 1, 128>}, {pipeline_mode = #tpu.pipeline_mode<synchronous>, transform_indices = @transform_3, window_bounds = array<i64: 128, 128>}, {transform_indices = @transform_4, window_bounds = array<i64: 64, 128>}, {transform_indices = @transform_5, window_bounds = array<i64: 8, 128>}, {transform_indices = @transform_6, window_bounds = array<i64: 8, 128>}]} {
    %c0 = arith.constant 0 : index
    %c0_0 = arith.constant 0 : index
    %0 = vector.load %arg1[%c0, %c0_0] : memref<64x128xf32, #tpu.memory_space<vmem>>, vector<64x128xf32>
    %c0_1 = arith.constant 0 : index
    %c0_2 = arith.constant 0 : index
    %1 = vector.load %arg2[%c0_1, %c0_2] : memref<1x128xf32, #tpu.memory_space<vmem>>, vector<1x128xf32>
    %2 = vector.broadcast %1 : vector<1x128xf32> to vector<64x128xf32>
    %3 = arith.mulf %0, %2 : vector<64x128xf32>
    %c0_3 = arith.constant 0 : index
    %c0_4 = arith.constant 0 : index
    %4 = vector.load %arg3[%c0_3, %c0_4] : memref<1x128xf32, #tpu.memory_space<vmem>>, vector<1x128xf32>
    %5 = vector.broadcast %4 : vector<1x128xf32> to vector<64x128xf32>
    %6 = arith.addf %3, %5 : vector<64x128xf32>
    %cst = arith.constant 0.000000e+00 : f32
    %7 = vector.broadcast %cst : f32 to vector<64x128xf32>
    %8 = arith.maximumf %6, %7 : vector<64x128xf32>
    %c0_5 = arith.constant 0 : index
    %c0_6 = arith.constant 0 : index
    %9 = vector.load %arg4[%c0_5, %c0_6] : memref<128x128xf32, #tpu.memory_space<vmem>>, vector<128x128xf32>
    %cst_7 = arith.constant dense<0.000000e+00> : vector<64x128xf32>
    %10 = tpu.matmul %8, %9, %cst_7 {dimension_numbers = #tpu.dot_dimension_numbers<[1], [0], [0], [1], [0, 0, 1, 1], [], []>} : vector<64x128xf32>, vector<128x128xf32>, vector<64x128xf32> -> vector<64x128xf32>
    %c0_8 = arith.constant 0 : index
    %c0_9 = arith.constant 0 : index
    %11 = vector.load %arg5[%c0_8, %c0_9] : memref<64x128xf32, #tpu.memory_space<vmem>>, vector<64x128xf32>
    tpu.vector_store %arg5[%c0_8, %c0_9], %10 {strides = array<i32>} : memref<64x128xf32, #tpu.memory_space<vmem>>, vector<64x128xf32>,
    %cst_10 = arith.constant dense<0.000000e+00> : vector<128xf32>
    %12 = vector.multi_reduction <add>, %10, %cst_10 [0] : vector<64x128xf32> to vector<128xf32>
    %13 = vector.shape_cast %12 : vector<128xf32> to vector<1x128xf32>
    %14 = vector.shape_cast %13 : vector<1x128xf32> to vector<1x128xf32>
    %15 = vector.broadcast %14 : vector<1x128xf32> to vector<8x128xf32>
    %c0_11 = arith.constant 0 : index
    %c0_12 = arith.constant 0 : index
    %16 = vector.load %arg6[%c0_11, %c0_12] : memref<8x128xf32, #tpu.memory_space<vmem>>, vector<8x128xf32>
    tpu.vector_store %arg6[%c0_11, %c0_12], %15 {strides = array<i32>} : memref<8x128xf32, #tpu.memory_space<vmem>>, vector<8x128xf32>,
    %17 = arith.mulf %10, %10 : vector<64x128xf32>
    %cst_13 = arith.constant dense<0.000000e+00> : vector<128xf32>
    %18 = vector.multi_reduction <add>, %17, %cst_13 [0] : vector<64x128xf32> to vector<128xf32>
    %19 = vector.shape_cast %18 : vector<128xf32> to vector<1x128xf32>
    %20 = vector.shape_cast %19 : vector<1x128xf32> to vector<1x128xf32>
    %21 = vector.broadcast %20 : vector<1x128xf32> to vector<8x128xf32>
    %c0_14 = arith.constant 0 : index
    %c0_15 = arith.constant 0 : index
    %22 = vector.load %arg7[%c0_14, %c0_15] : memref<8x128xf32, #tpu.memory_space<vmem>>, vector<8x128xf32>
    tpu.vector_store %arg7[%c0_14, %c0_15], %21 {strides = array<i32>} : memref<8x128xf32, #tpu.memory_space<vmem>>, vector<8x128xf32>,
    return
  }
  func.func @transform_0(%arg0: i32) -> (i32, i32) {
    %c0_i32 = arith.constant 0 : i32
    %c0_i32_0 = arith.constant 0 : i32
    return %arg0, %c0_i32 : i32, i32
  }
  func.func @transform_1(%arg0: i32) -> (i32, i32) {
    %c0_i32 = arith.constant 0 : i32
    %c0_i32_0 = arith.constant 0 : i32
    %c0_i32_1 = arith.constant 0 : i32
    return %c0_i32, %c0_i32_0 : i32, i32
  }
  func.func @transform_2(%arg0: i32) -> (i32, i32) {
    %c0_i32 = arith.constant 0 : i32
    %c0_i32_0 = arith.constant 0 : i32
    %c0_i32_1 = arith.constant 0 : i32
    return %c0_i32, %c0_i32_0 : i32, i32
  }
  func.func @transform_3(%arg0: i32) -> (i32, i32) {
    %c0_i32 = arith.constant 0 : i32
    %c0_i32_0 = arith.constant 0 : i32
    %c0_i32_1 = arith.constant 0 : i32
    return %c0_i32, %c0_i32_0 : i32, i32
  }
  func.func @transform_4(%arg0: i32) -> (i32, i32) {
    %c0_i32 = arith.constant 0 : i32
    %c0_i32_0 = arith.constant 0 : i32
    return %arg0, %c0_i32 : i32, i32
  }
  func.func @transform_5(%arg0: i32) -> (i32, i32) {
    %c0_i32 = arith.constant 0 : i32
    %c0_i32_0 = arith.constant 0 : i32
    return %arg0, %c0_i32 : i32, i32
  }
  func.func @transform_6(%arg0: i32) -> (i32, i32) {
    %c0_i32 = arith.constant 0 : i32
    %c0_i32_0 = arith.constant 0 : i32
    return %arg0, %c0_i32 : i32, i32
  }
}

module attributes {stable_mosaic.version = 11 : i64} {
  func.func @_conv_stats_kernel(%arg0: i32, %arg1: memref<64x1152xf32, #tpu.memory_space<vmem>>, %arg2: memref<1152x128xf32, #tpu.memory_space<vmem>>, %arg3: memref<64x128xf32, #tpu.memory_space<vmem>>, %arg4: memref<8x128xf32, #tpu.memory_space<vmem>>, %arg5: memref<8x128xf32, #tpu.memory_space<vmem>>) attributes {dimension_semantics = [#tpu.dimension_semantics<parallel>], iteration_bounds = array<i64: 2>, scalar_prefetch = 0 : i64, scratch_operands = 0 : i64, tpu.core_type = #tpu.core_type<tc>, window_params = [{transform_indices = @transform_0, window_bounds = array<i64: 64, 1152>}, {pipeline_mode = #tpu.pipeline_mode<synchronous>, transform_indices = @transform_1, window_bounds = array<i64: 1152, 128>}, {transform_indices = @transform_2, window_bounds = array<i64: 64, 128>}, {transform_indices = @transform_3, window_bounds = array<i64: 8, 128>}, {transform_indices = @transform_4, window_bounds = array<i64: 8, 128>}]} {
    %c0 = arith.constant 0 : index
    %c0_0 = arith.constant 0 : index
    %0 = vector.load %arg1[%c0, %c0_0] : memref<64x1152xf32, #tpu.memory_space<vmem>>, vector<64x1152xf32>
    %c0_1 = arith.constant 0 : index
    %c0_2 = arith.constant 0 : index
    %1 = vector.load %arg2[%c0_1, %c0_2] : memref<1152x128xf32, #tpu.memory_space<vmem>>, vector<1152x128xf32>
    %cst = arith.constant dense<0.000000e+00> : vector<64x128xf32>
    %2 = tpu.matmul %0, %1, %cst {dimension_numbers = #tpu.dot_dimension_numbers<[1], [0], [0], [1], [0, 0, 1, 1], [], []>} : vector<64x1152xf32>, vector<1152x128xf32>, vector<64x128xf32> -> vector<64x128xf32>
    %c0_3 = arith.constant 0 : index
    %c0_4 = arith.constant 0 : index
    %3 = vector.load %arg3[%c0_3, %c0_4] : memref<64x128xf32, #tpu.memory_space<vmem>>, vector<64x128xf32>
    tpu.vector_store %arg3[%c0_3, %c0_4], %2 {strides = array<i32>} : memref<64x128xf32, #tpu.memory_space<vmem>>, vector<64x128xf32>,
    %cst_5 = arith.constant dense<0.000000e+00> : vector<128xf32>
    %4 = vector.multi_reduction <add>, %2, %cst_5 [0] : vector<64x128xf32> to vector<128xf32>
    %5 = vector.shape_cast %4 : vector<128xf32> to vector<1x128xf32>
    %6 = vector.shape_cast %5 : vector<1x128xf32> to vector<1x128xf32>
    %7 = vector.broadcast %6 : vector<1x128xf32> to vector<8x128xf32>
    %c0_6 = arith.constant 0 : index
    %c0_7 = arith.constant 0 : index
    %8 = vector.load %arg4[%c0_6, %c0_7] : memref<8x128xf32, #tpu.memory_space<vmem>>, vector<8x128xf32>
    tpu.vector_store %arg4[%c0_6, %c0_7], %7 {strides = array<i32>} : memref<8x128xf32, #tpu.memory_space<vmem>>, vector<8x128xf32>,
    %9 = arith.mulf %2, %2 : vector<64x128xf32>
    %cst_8 = arith.constant dense<0.000000e+00> : vector<128xf32>
    %10 = vector.multi_reduction <add>, %9, %cst_8 [0] : vector<64x128xf32> to vector<128xf32>
    %11 = vector.shape_cast %10 : vector<128xf32> to vector<1x128xf32>
    %12 = vector.shape_cast %11 : vector<1x128xf32> to vector<1x128xf32>
    %13 = vector.broadcast %12 : vector<1x128xf32> to vector<8x128xf32>
    %c0_9 = arith.constant 0 : index
    %c0_10 = arith.constant 0 : index
    %14 = vector.load %arg5[%c0_9, %c0_10] : memref<8x128xf32, #tpu.memory_space<vmem>>, vector<8x128xf32>
    tpu.vector_store %arg5[%c0_9, %c0_10], %13 {strides = array<i32>} : memref<8x128xf32, #tpu.memory_space<vmem>>, vector<8x128xf32>,
    return
  }
  func.func @transform_0(%arg0: i32) -> (i32, i32) {
    %c0_i32 = arith.constant 0 : i32
    %c0_i32_0 = arith.constant 0 : i32
    return %arg0, %c0_i32 : i32, i32
  }
  func.func @transform_1(%arg0: i32) -> (i32, i32) {
    %c0_i32 = arith.constant 0 : i32
    %c0_i32_0 = arith.constant 0 : i32
    %c0_i32_1 = arith.constant 0 : i32
    return %c0_i32, %c0_i32_0 : i32, i32
  }
  func.func @transform_2(%arg0: i32) -> (i32, i32) {
    %c0_i32 = arith.constant 0 : i32
    %c0_i32_0 = arith.constant 0 : i32
    return %arg0, %c0_i32 : i32, i32
  }
  func.func @transform_3(%arg0: i32) -> (i32, i32) {
    %c0_i32 = arith.constant 0 : i32
    %c0_i32_0 = arith.constant 0 : i32
    return %arg0, %c0_i32 : i32, i32
  }
  func.func @transform_4(%arg0: i32) -> (i32, i32) {
    %c0_i32 = arith.constant 0 : i32
    %c0_i32_0 = arith.constant 0 : i32
    return %arg0, %c0_i32 : i32, i32
  }
}

module attributes {stable_mosaic.version = 11 : i64} {
  func.func @_bn_apply_kernel(%arg0: i32, %arg1: memref<64x128xf32, #tpu.memory_space<vmem>>, %arg2: memref<1x128xf32, #tpu.memory_space<vmem>>, %arg3: memref<1x128xf32, #tpu.memory_space<vmem>>, %arg4: memref<64x128xf32, #tpu.memory_space<vmem>>) attributes {dimension_semantics = [#tpu.dimension_semantics<parallel>], iteration_bounds = array<i64: 2>, scalar_prefetch = 0 : i64, scratch_operands = 0 : i64, tpu.core_type = #tpu.core_type<tc>, window_params = [{transform_indices = @transform_0, window_bounds = array<i64: 64, 128>}, {pipeline_mode = #tpu.pipeline_mode<synchronous>, transform_indices = @transform_1, window_bounds = array<i64: 1, 128>}, {pipeline_mode = #tpu.pipeline_mode<synchronous>, transform_indices = @transform_2, window_bounds = array<i64: 1, 128>}, {transform_indices = @transform_3, window_bounds = array<i64: 64, 128>}]} {
    %c0 = arith.constant 0 : index
    %c0_0 = arith.constant 0 : index
    %0 = vector.load %arg1[%c0, %c0_0] : memref<64x128xf32, #tpu.memory_space<vmem>>, vector<64x128xf32>
    %c0_1 = arith.constant 0 : index
    %c0_2 = arith.constant 0 : index
    %1 = vector.load %arg2[%c0_1, %c0_2] : memref<1x128xf32, #tpu.memory_space<vmem>>, vector<1x128xf32>
    %2 = vector.broadcast %1 : vector<1x128xf32> to vector<64x128xf32>
    %3 = arith.mulf %0, %2 : vector<64x128xf32>
    %c0_3 = arith.constant 0 : index
    %c0_4 = arith.constant 0 : index
    %4 = vector.load %arg3[%c0_3, %c0_4] : memref<1x128xf32, #tpu.memory_space<vmem>>, vector<1x128xf32>
    %5 = vector.broadcast %4 : vector<1x128xf32> to vector<64x128xf32>
    %6 = arith.addf %3, %5 : vector<64x128xf32>
    %c0_5 = arith.constant 0 : index
    %c0_6 = arith.constant 0 : index
    %7 = vector.load %arg4[%c0_5, %c0_6] : memref<64x128xf32, #tpu.memory_space<vmem>>, vector<64x128xf32>
    tpu.vector_store %arg4[%c0_5, %c0_6], %6 {strides = array<i32>} : memref<64x128xf32, #tpu.memory_space<vmem>>, vector<64x128xf32>,
    return
  }
  func.func @transform_0(%arg0: i32) -> (i32, i32) {
    %c0_i32 = arith.constant 0 : i32
    %c0_i32_0 = arith.constant 0 : i32
    return %arg0, %c0_i32 : i32, i32
  }
  func.func @transform_1(%arg0: i32) -> (i32, i32) {
    %c0_i32 = arith.constant 0 : i32
    %c0_i32_0 = arith.constant 0 : i32
    %c0_i32_1 = arith.constant 0 : i32
    return %c0_i32, %c0_i32_0 : i32, i32
  }
  func.func @transform_2(%arg0: i32) -> (i32, i32) {
    %c0_i32 = arith.constant 0 : i32
    %c0_i32_0 = arith.constant 0 : i32
    %c0_i32_1 = arith.constant 0 : i32
    return %c0_i32, %c0_i32_0 : i32, i32
  }
  func.func @transform_3(%arg0: i32) -> (i32, i32) {
    %c0_i32 = arith.constant 0 : i32
    %c0_i32_0 = arith.constant 0 : i32
    return %arg0, %c0_i32 : i32, i32
  }
}

</mosaic_0001>

<bundles_post_ra>
// kernel: bottleneck_forward.5
= control target key start
LH: loop header
LB: loop body
LE: loop exit
PB: predicated region body
PF: predicated region fallthrough
CT: control target
= control target key end

     0   :  { %s683_s15 = smov 0   ;;  %s776_s0 = inlined_call_operand.vmem [shape: f32[512,128], index: 0, kind: input, shape index: {}]   ;;  %s777_s1 = inlined_call_operand.vmem [shape: f32[128,128], index: 1, kind: input, shape index: {}]   ;;  %s778_s2 = inlined_call_operand.vmem [shape: f32[512,128], index: 2, kind: output, shape index: {0}]   ;;  %s779_s3 = inlined_call_operand.vmem [shape: f32[64,128], index: 3, kind: output, shape index: {1}]   ;;  %s780_s4 = inlined_call_operand.vmem [shape: f32[64,128], index: 4, kind: output, shape index: {2}]  }
   0x1 LB: > { %s689_s16 = sadd.s32 4294967295, %s656_s15   ;;  %p517_p0 = scmp.ge.s32.totalorder %s656_s15, 1  ;;  %s656_s15 = sphi %s683_s15, %s15_s15  }
   0x2   : > { %p168_p1 = scmp.lt.s32.totalorder %s656_s15, 9 }
   0x4   : > { %p169_p2 = pnand %p517_p0, %p168_p1 }
   0x5   : > { %v230_v0 = vld [vmem:[%s777_s1] sm:$0xff] (!%p169_p2)  ;;  %v231_v1 = vld [vmem:[%s777_s1 + $0x8] sm:$0xff] (!%p169_p2)  ;;  %v232_v2 = vld [vmem:[%s777_s1 + $0x10] sm:$0xff] (!%p169_p2)  ;;  %s518_s23 = sshll.u32 (!%p169_p2), %s689_s16, 3  ;;  %p214_p4 = scmp.lt.s32.totalorder (!%p169_p2), %s689_s16, 7 }
   0x6   : > { %172 = sbr.rel (%p169_p2) target bundleno = 284 (0x11c), region = 28  ;;  %v594_v3 = vpack.c.bf16 (!%p169_p2), %v231_v1, %v230_v0  ;;  %v233_v4 = vld [vmem:[%s777_s1 + $0x18] sm:$0xff] (!%p169_p2)  ;;  %p203_p3 = scmp.lt.s32.totalorder (!%p169_p2), %s518_s23, 63  ;;  %v234_v6 = vld [vmem:[%s777_s1 + $0x20] sm:$0xff] (!%p169_p2)  ;;  %v235_v7 = vld [vmem:[%s777_s1 + $0x28] sm:$0xff] (!%p169_p2) }
   0x7   : > { %v598_v5 = vpack.c.bf16 (!%p169_p2), %v233_v4, %v232_v2  ;;  %v602_v8 = vpack.c.bf16 (!%p169_p2), %v235_v7, %v234_v6  ;;  %v236_v9 = vld [vmem:[%s777_s1 + $0x30] sm:$0xff] (!%p169_p2)  ;;  %v237_v10 = vld [vmem:[%s777_s1 + $0x38] sm:$0xff] (!%p169_p2)  ;;  %v238_v14 = vld [vmem:[%s777_s1 + $0x40] sm:$0xff] (!%p169_p2) }
   0x8   : > { %595 = vmatprep.subr.bf16.mxu0 (!%p169_p2), %v594_v3  ;;  %626 = vmatprep.subr.bf16.mxu1 (!%p169_p2), %v594_v3  ;;  %v606_v13 = vpack.c.bf16 (!%p169_p2), %v237_v10, %v236_v9  ;;  %v239_v15 = vld [vmem:[%s777_s1 + $0x48] sm:$0xff] (!%p169_p2)  ;;  %v240_v17 = vld [vmem:[%s777_s1 + $0x50] sm:$0xff] (!%p169_p2)  ;;  %v241_v18 = vld [vmem:[%s777_s1 + $0x58] sm:$0xff] (!%p169_p2) }
   0x9   : > { %597 = vmatpush3.bf16.msra.mxu0 (!%p169_p2), %v594_v3  ;;  %634 = vmatpush3.bf16.msra.mxu1 (!%p169_p2), %v594_v3  ;;  %v610_v16 = vpack.c.bf16 (!%p169_p2), %v239_v15, %v238_v14  ;;  %v614_v19 = vpack.c.bf16 (!%p169_p2), %v241_v18, %v240_v17  ;;  %v242_v20 = vld [vmem:[%s777_s1 + $0x60] sm:$0xff] (!%p169_p2)  ;;  %v243_v21 = vld [vmem:[%s777_s1 + $0x68] sm:$0xff] (!%p169_p2)  ;;  %v244_v23 = vld [vmem:[%s777_s1 + $0x70] sm:$0xff] (!%p169_p2) }
   0xa   : > { %599 = vmatprep.subr.bf16.mxu0 (!%p169_p2), %v598_v5  ;;  %627 = vmatprep.subr.bf16.mxu1 (!%p169_p2), %v598_v5  ;;  %v618_v22 = vpack.c.bf16 (!%p169_p2), %v243_v21, %v242_v20  ;;  %v245_v24 = vld [vmem:[%s777_s1 + $0x78] sm:$0xff] (!%p169_p2) }
   0xb   : > { %v622_v25 = vpack.c.bf16 (!%p169_p2), %v245_v24, %v244_v23 }
   0xd   : > { %s782_s23 = smov (!%p203_p3, %s518_s23), 63  ;;  %601 = vmatpush3.bf16.msra.mxu0 %v598_v5  ;;  %635 = vmatpush3.bf16.msra.mxu1 %v598_v5  ;;  %s784_s16 = smov (!%p214_p4, %s689_s16), 7 }
   0xe   : > { %s519_s30 = sshll.u32 %s782_s23, 3  ;;  %603 = vmatprep.subr.bf16.mxu0 %v602_v8  ;;  %628 = vmatprep.subr.bf16.mxu1 %v602_v8  ;;  %s522_s23 = sshll.u32 %s784_s16, 3 }
   0xf   : > { %s726_s11 = scalar_lea.vmem %s776_s0, %s519_s30  ;;  %s212_s8 = scalar_lea.vmem %s778_s2, %s519_s30 }
  0x10   : > { %v222_v11 = vld [vmem:[%s726_s11] sm:$0xff]  ;;  %v223_v26 = vld [vmem:[%s726_s11 + $0x8] sm:$0xff]  ;;  %v224_v28 = vld [vmem:[%s726_s11 + $0x10] sm:$0xff]  ;;  %s217_s10 = scalar_lea.vmem %s779_s3, %s522_s23  ;;  %s221_s13 = scalar_lea.vmem %s780_s4, %s522_s23 }
  0x11   : > { %v226_v12 = vld [vmem:[%s726_s11 + $0x20] sm:$0xff]  ;;  %582 = vmatprep.mubr.f32.mxu0 %v222_v11  ;;  %605 = vmatpush3.bf16.msra.mxu0 %v602_v8  ;;  %v227_v27 = vld [vmem:[%s726_s11 + $0x28] sm:$0xff]  ;;  %v228_v29 = vld [vmem:[%s726_s11 + $0x30] sm:$0xff] }
  0x12   : > { %588 = vmatprep.mubr.f32.mxu1 %v226_v12  ;;  %636 = vmatpush3.bf16.msra.mxu1 %v602_v8  ;;  %v225_v30 = vld [vmem:[%s726_s11 + $0x18] sm:$0xff] }
  0x13   : > { %607 = vmatprep.subr.bf16.mxu0 %v606_v13  ;;  %629 = vmatprep.subr.bf16.mxu1 %v606_v13  ;;  %v229_v31 = vld [vmem:[%s726_s11 + $0x38] sm:$0xff] }
  0x15   : > { %609 = vmatpush3.bf16.msra.mxu0 %v606_v13 }
  0x16   : > { %637 = vmatpush3.bf16.msra.mxu1 %v606_v13  ;;  %611 = vmatprep.subr.bf16.mxu0 %v610_v16 }
  0x17   : > { %630 = vmatprep.subr.bf16.mxu1 %v610_v16 }
  0x19   : > { %613 = vmatpush3.bf16.msra.mxu0 %v610_v16 }
  0x1a   : > { %638 = vmatpush3.bf16.msra.mxu1 %v610_v16  ;;  %615 = vmatprep.subr.bf16.mxu0 %v614_v19 }
  0x1b   : > { %631 = vmatprep.subr.bf16.mxu1 %v614_v19 }
  0x1d   : > { %617 = vmatpush3.bf16.msra.mxu0 %v614_v19 }
  0x1e   : > { %639 = vmatpush3.bf16.msra.mxu1 %v614_v19  ;;  %619 = vmatprep.subr.bf16.mxu0 %v618_v22 }
  0x1f   : > { %632 = vmatprep.subr.bf16.mxu1 %v618_v22 }
  0x21   : > { %621 = vmatpush3.bf16.msra.mxu0 %v618_v22 }
  0x22   : > { %640 = vmatpush3.bf16.msra.mxu1 %v618_v22  ;;  %623 = vmatprep.subr.bf16.mxu0 %v622_v25 }
  0x23   : > { %633 = vmatprep.subr.bf16.mxu1 %v622_v25 }
  0x25   : > { %625 = vmatpush3.bf16.msra.mxu0 %v622_v25 }
  0x26   : > { %641 = vmatpush3.bf16.msra.mxu1 %v622_v25 }
  0x28   : > { %583 = vmatmul.mubr.f32.vlgmr.msra.gmra.mrb[0].mxu0 %v223_v26 }
  0x29   : > { %589 = vmatmul.mubr.f32.vlgmr.msra.gmra.mrb[0].mxu1 %v227_v27  ;;  %585 = vmatprep.mubr.f32.mxu0 %v224_v28 }
  0x2a   : > { %591 = vmatprep.mubr.f32.mxu1 %v228_v29 }
  0x2c   : > { %586 = vmatmul.mubr.f32.gmra.mrb[2].mxu0 %v225_v30 }
  0x2d   : > { %592 = vmatmul.mubr.f32.gmra.mrb[2].mxu1 %v229_v31 }
  0xfb   : > { %v584_v32 = vpop.f32.mrb[0].mxu0 }
  0xfc   : > { %v590_v33 = vpop.f32.mrb[0].mxu1  ;;  %352 = vst [vmem:[%s212_s8 + $0x8] sm:$0xff] %v584_v32  ;;  %v374_v34 = vmul.f32 %v584_v32, %v584_v32  ;;  %v312_v35 = vpop.f32.mrb[1].mxu0 }
  0xfd   : > { %356 = vst [vmem:[%s212_s8 + $0x28] sm:$0xff] %v590_v33  ;;  %v332_v36 = vpop.f32.mrb[1].mxu1  ;;  %351 = vst [vmem:[%s212_s8] sm:$0xff] %v312_v35  ;;  %v359_v37 = vadd.f32 %v584_v32, %v312_v35  ;;  %v373_v38 = vmul.f32 %v312_v35, %v312_v35  ;;  %v378_v52 = vmul.f32 %v590_v33, %v590_v33 }
  0xfe   : > { %355 = vst [vmem:[%s212_s8 + $0x20] sm:$0xff] %v332_v36  ;;  %v377_v49 = vmul.f32 %v332_v36, %v332_v36 }
  0xff   : > { %v381_v39 = vadd.f32 %v374_v34, %v373_v38  ;;  %v587_v40 = vpop.f32.mrb[2].mxu0 }
 0x100   : > { %v593_v41 = vpop.f32.mrb[2].mxu1  ;;  %354 = vst [vmem:[%s212_s8 + $0x18] sm:$0xff] %v587_v40  ;;  %v322_v42 = vpop.f32.mrb[3].mxu0  ;;  %v376_v46 = vmul.f32 %v587_v40, %v587_v40 }
 0x101   : > { %358 = vst [vmem:[%s212_s8 + $0x38] sm:$0xff] %v593_v41  ;;  %v342_v43 = vpop.f32.mrb[3].mxu1  ;;  %353 = vst [vmem:[%s212_s8 + $0x10] sm:$0xff] %v322_v42  ;;  %v360_v44 = vadd.f32 %v359_v37, %v322_v42  ;;  %v375_v45 = vmul.f32 %v322_v42, %v322_v42  ;;  %v380_v58 = vmul.f32 %v593_v41, %v593_v41 }
 0x102   : > { %357 = vst [vmem:[%s212_s8 + $0x30] sm:$0xff] %v342_v43  ;;  %v379_v55 = vmul.f32 %v342_v43, %v342_v43 }
 0x103   : > { %v361_v47 = vadd.f32 %v587_v40, %v360_v44  ;;  %v382_v48 = vadd.f32 %v381_v39, %v375_v45 }
 0x105   : > { %v383_v50 = vadd.f32 %v382_v48, %v376_v46  ;;  %v362_v51 = vadd.f32 %v361_v47, %v332_v36 }
 0x107   : > { %v384_v53 = vadd.f32 %v383_v50, %v377_v49  ;;  %v363_v54 = vadd.f32 %v590_v33, %v362_v51 }
 0x109   : > { %v364_v56 = vadd.f32 %v363_v54, %v342_v43  ;;  %v385_v57 = vadd.f32 %v384_v53, %v378_v52 }
 0x10b   : > { %v365_v59 = vadd.f32 %v593_v41, %v364_v56  ;;  %v386_v60 = vadd.f32 %v385_v57, %v379_v55 }
 0x10d   : > { %v366_v61 = vrot.slane %v365_v59, 4  ;;  %v387_v62 = vadd.f32 %v386_v60, %v380_v58 }
 0x10f   : > { %v367_v63 = vadd.f32 %v366_v61, %v365_v59  ;;  %v388_v0 = vrot.slane %v387_v62, 4 }
 0x111   : > { %v368_v1 = vrot.slane %v367_v63, 2  ;;  %v389_v2 = vadd.f32 %v388_v0, %v387_v62 }
 0x113   : > { %v369_v3 = vadd.f32 %v368_v1, %v367_v63  ;;  %v390_v4 = vrot.slane %v389_v2, 2 }
 0x115   : > { %v370_v5 = vrot.slane %v369_v3, 1  ;;  %v391_v6 = vadd.f32 %v390_v4, %v389_v2 }
 0x117   : > { %v371_v7 = vadd.f32 %v370_v5, %v369_v3  ;;  %v392_v8 = vrot.slane %v391_v6, 1 }
 0x119   : > { %372 = vst [vmem:[%s217_s10] sm:$0xff] %v371_v7  ;;  %v393_v9 = vadd.f32 %v392_v8, %v391_v6 }
 0x11b   : > { %394 = vst [vmem:[%s221_s13] sm:$0xff] %v393_v9 }
 0x11c PF: > { %s15_s15 = sadd.s32 1, %s656_s15  }
 0x11d   : > { %p12_p5 = scmp.ge.s32.totalorder %s15_s15, 10  }
 0x11f   :  { %14 = sbr.rel (!%p12_p5) target bundleno = 1 (0x1), region = 82 }

// kernel: bottleneck_forward.6
= control target key start
LH: loop header
LB: loop body
LE: loop exit
PB: predicated region body
PF: predicated region fallthrough
CT: control target
= control target key end

     0   :  { %s333_s12 = smov 0   ;;  %s356_s0 = inlined_call_operand.vmem [shape: f32[512,128], index: 0, kind: input, shape index: {}]   ;;  %s357_s1 = inlined_call_operand.vmem [shape: f32[1,128], index: 1, kind: input, shape index: {}]   ;;  %s358_s2 = inlined_call_operand.vmem [shape: f32[1,128], index: 2, kind: input, shape index: {}]   ;;  %s359_s3 = inlined_call_operand.vmem [shape: f32[512,128], index: 3, kind: output, shape index: {}]  }
   0x1 LB: > { %s284_s13 = sadd.s32 4294967295, %s311_s12   ;;  %p288_p0 = scmp.ge.s32.totalorder %s311_s12, 1  ;;  %s311_s12 = sphi %s333_s12, %s13_s12  }
   0x2   : > { %p138_p1 = scmp.lt.s32.totalorder %s311_s12, 9 }
   0x4   : > { %p139_p2 = pnand %p288_p0, %p138_p1 }
   0x5   : > { %s289_s14 = sshll.u32 (!%p139_p2), %s284_s13, 3  ;;  %v293_v0 = vld [vmem:[%s357_s1] ss:$0 sm:$0xff] (!%p139_p2) }
   0x6   : > { %142 = sbr.rel (%p139_p2) target bundleno = 27 (0x1b), region = 32  ;;  %p163_p3 = scmp.lt.s32.totalorder (!%p139_p2), %s289_s14, 63  ;;  %v294_v1 = vld [vmem:[%s358_s2] ss:$0 sm:$0xff] (!%p139_p2) }
   0xd   : > { %s361_s14 = smov (!%p163_p3, %s289_s14), 63 }
   0xe   : > { %s290_s15 = sshll.u32 %s361_s14, 3 }
   0xf   : > { %s166_s20 = scalar_lea.vmem %s356_s0, %s290_s15  ;;  %s172_s25 = scalar_lea.vmem %s359_s3, %s290_s15 }
  0x10   : > { %v174_v2 = vld [vmem:[%s166_s20] sm:$0xff]  ;;  %v175_v3 = vld [vmem:[%s166_s20 + $0x8] sm:$0xff]  ;;  %v176_v4 = vld [vmem:[%s166_s20 + $0x10] sm:$0xff] }
  0x11   : > { %v189_v5 = vmul.f32 %v293_v0, %v174_v2  ;;  %v190_v6 = vmul.f32 %v293_v0, %v175_v3  ;;  %v191_v7 = vmul.f32 %v293_v0, %v176_v4  ;;  %v177_v8 = vld [vmem:[%s166_s20 + $0x18] sm:$0xff]  ;;  %v178_v9 = vld [vmem:[%s166_s20 + $0x20] sm:$0xff]  ;;  %v179_v10 = vld [vmem:[%s166_s20 + $0x28] sm:$0xff] }
  0x12   : > { %v192_v11 = vmul.f32 %v293_v0, %v177_v8  ;;  %v193_v12 = vmul.f32 %v293_v0, %v178_v9  ;;  %v194_v13 = vmul.f32 %v293_v0, %v179_v10  ;;  %v180_v14 = vld [vmem:[%s166_s20 + $0x30] sm:$0xff]  ;;  %v181_v15 = vld [vmem:[%s166_s20 + $0x38] sm:$0xff] }
  0x13   : > { %v204_v16 = vadd.f32 %v294_v1, %v189_v5  ;;  %v205_v17 = vadd.f32 %v294_v1, %v190_v6  ;;  %v206_v18 = vadd.f32 %v294_v1, %v191_v7  ;;  %v195_v19 = vmul.f32 %v293_v0, %v180_v14 }
  0x14   : > { %v207_v20 = vadd.f32 %v294_v1, %v192_v11  ;;  %v208_v21 = vadd.f32 %v294_v1, %v193_v12  ;;  %v209_v22 = vadd.f32 %v294_v1, %v194_v13  ;;  %v196_v23 = vmul.f32 %v293_v0, %v181_v15 }
  0x15   : > { %v212_v24 = vmax.f32 %v204_v16, 0.0  ;;  %v213_v25 = vmax.f32 %v205_v17, 0.0  ;;  %v214_v26 = vmax.f32 %v206_v18, 0.0  ;;  %v210_v27 = vadd.f32 %v294_v1, %v195_v19 }
  0x16   : > { %v215_v28 = vmax.f32 %v207_v20, 0.0  ;;  %v216_v29 = vmax.f32 %v208_v21, 0.0  ;;  %v217_v30 = vmax.f32 %v209_v22, 0.0  ;;  %v211_v31 = vadd.f32 %v294_v1, %v196_v23 }
  0x17   : > { %220 = vst [vmem:[%s172_s25] sm:$0xff] %v212_v24  ;;  %221 = vst [vmem:[%s172_s25 + $0x8] sm:$0xff] %v213_v25  ;;  %v218_v32 = vmax.f32 %v210_v27, 0.0 }
  0x18   : > { %222 = vst [vmem:[%s172_s25 + $0x10] sm:$0xff] %v214_v26  ;;  %223 = vst [vmem:[%s172_s25 + $0x18] sm:$0xff] %v215_v28  ;;  %v219_v33 = vmax.f32 %v211_v31, 0.0 }
  0x19   : > { %224 = vst [vmem:[%s172_s25 + $0x20] sm:$0xff] %v216_v29  ;;  %225 = vst [vmem:[%s172_s25 + $0x28] sm:$0xff] %v217_v30 }
  0x1a   : > { %226 = vst [vmem:[%s172_s25 + $0x30] sm:$0xff] %v218_v32  ;;  %227 = vst [vmem:[%s172_s25 + $0x38] sm:$0xff] %v219_v33 }
  0x1b PF: > { %s13_s12 = sadd.s32 1, %s311_s12  }
  0x1c   : > { %p10_p4 = scmp.ge.s32.totalorder %s13_s12, 10  }
  0x1e   :  { %12 = sbr.rel (!%p10_p4) target bundleno = 1 (0x1), region = 62 }

// kernel: bottleneck_forward.8
= control target key start
LH: loop header
LB: loop body
LE: loop exit
PB: predicated region body
PF: predicated region fallthrough
CT: control target
= control target key end

     0   :  { %s787_s21 = smov 0   ;;  %s896_s0 = inlined_call_operand.vmem [shape: f32[128,128], index: 0, kind: input, shape index: {}]   ;;  %s897_s1 = inlined_call_operand.vmem [shape: f32[1,128], index: 1, kind: input, shape index: {}]   ;;  %s898_s2 = inlined_call_operand.vmem [shape: f32[1,128], index: 2, kind: input, shape index: {}]   ;;  %s899_s3 = inlined_call_operand.vmem [shape: f32[128,128], index: 3, kind: input, shape index: {}]   ;;  %s900_s4 = inlined_call_operand.vmem [shape: f32[128,128], index: 4, kind: output, shape index: {0}]   ;;  %s901_s5 = inlined_call_operand.vmem [shape: f32[16,128], index: 5, kind: output, shape index: {1}]   ;;  %s902_s6 = inlined_call_operand.vmem [shape: f32[16,128], index: 6, kind: output, shape index: {2}]  }
   0x1 LB: > { %s793_s22 = sadd.s32 4294967295, %s750_s21   ;;  %p609_p0 = scmp.ge.s32.totalorder %s750_s21, 1  ;;  %s750_s21 = sphi %s787_s21, %s17_s21  }
   0x2   : > { %p218_p1 = scmp.lt.s32.totalorder %s750_s21, 3 }
   0x4   : > { %p219_p2 = pnand %p609_p0, %p218_p1 }
   0x5   : > { %v322_v0 = vld [vmem:[%s899_s3] sm:$0xff] (!%p219_p2)  ;;  %v323_v1 = vld [vmem:[%s899_s3 + $0x8] sm:$0xff] (!%p219_p2)  ;;  %v324_v2 = vld [vmem:[%s899_s3 + $0x10] sm:$0xff] (!%p219_p2)  ;;  %s610_s29 = sshll.u32 (!%p219_p2), %s793_s22, 3  ;;  %p268_p4 = scmp.lt.s32.totalorder (!%p219_p2), %s793_s22, 1 }
   0x6   : > { %222 = sbr.rel (%p219_p2) target bundleno = 284 (0x11c), region = 36  ;;  %v688_v3 = vpack.c.bf16 (!%p219_p2), %v323_v1, %v322_v0  ;;  %v325_v4 = vld [vmem:[%s899_s3 + $0x18] sm:$0xff] (!%p219_p2)  ;;  %p257_p3 = scmp.lt.s32.totalorder (!%p219_p2), %s610_s29, 15  ;;  %v326_v6 = vld [vmem:[%s899_s3 + $0x20] sm:$0xff] (!%p219_p2)  ;;  %v327_v7 = vld [vmem:[%s899_s3 + $0x28] sm:$0xff] (!%p219_p2) }
   0x7   : > { %v692_v5 = vpack.c.bf16 (!%p219_p2), %v325_v4, %v324_v2  ;;  %v696_v8 = vpack.c.bf16 (!%p219_p2), %v327_v7, %v326_v6  ;;  %v616_v9 = vld [vmem:[%s897_s1] ss:$0 sm:$0xff] (!%p219_p2)  ;;  %v328_v10 = vld [vmem:[%s899_s3 + $0x30] sm:$0xff] (!%p219_p2)  ;;  %v329_v11 = vld [vmem:[%s899_s3 + $0x38] sm:$0xff] (!%p219_p2) }
   0x8   : > { %689 = vmatprep.subr.bf16.mxu0 (!%p219_p2), %v688_v3  ;;  %720 = vmatprep.subr.bf16.mxu1 (!%p219_p2), %v688_v3  ;;  %v839_v13 = vld [vmem:[%s898_s2] ss:$0 sm:$0xff] (!%p219_p2)  ;;  %v700_v16 = vpack.c.bf16 (!%p219_p2), %v329_v11, %v328_v10  ;;  %v331_v19 = vld [vmem:[%s899_s3 + $0x48] sm:$0xff] (!%p219_p2)  ;;  %v332_v25 = vld [vmem:[%s899_s3 + $0x50] sm:$0xff] (!%p219_p2) }
   0x9   : > { %691 = vmatpush3.bf16.msra.mxu0 (!%p219_p2), %v688_v3  ;;  %728 = vmatpush3.bf16.msra.mxu1 (!%p219_p2), %v688_v3  ;;  %v330_v18 = vld [vmem:[%s899_s3 + $0x40] sm:$0xff] (!%p219_p2)  ;;  %v333_v26 = vld [vmem:[%s899_s3 + $0x58] sm:$0xff] (!%p219_p2)  ;;  %v335_v29 = vld [vmem:[%s899_s3 + $0x68] sm:$0xff] (!%p219_p2) }
   0xa   : > { %693 = vmatprep.subr.bf16.mxu0 (!%p219_p2), %v692_v5  ;;  %721 = vmatprep.subr.bf16.mxu1 (!%p219_p2), %v692_v5  ;;  %v704_v23 = vpack.c.bf16 (!%p219_p2), %v331_v19, %v330_v18  ;;  %v708_v27 = vpack.c.bf16 (!%p219_p2), %v333_v26, %v332_v25  ;;  %v334_v28 = vld [vmem:[%s899_s3 + $0x60] sm:$0xff] (!%p219_p2)  ;;  %v336_v35 = vld [vmem:[%s899_s3 + $0x70] sm:$0xff] (!%p219_p2)  ;;  %v337_v36 = vld [vmem:[%s899_s3 + $0x78] sm:$0xff] (!%p219_p2) }
   0xb   : > { %v712_v32 = vpack.c.bf16 (!%p219_p2), %v335_v29, %v334_v28  ;;  %v716_v43 = vpack.c.bf16 (!%p219_p2), %v337_v36, %v336_v35 }
   0xd   : > { %s904_s29 = smov (!%p257_p3, %s610_s29), 15  ;;  %695 = vmatpush3.bf16.msra.mxu0 %v692_v5  ;;  %729 = vmatpush3.bf16.msra.mxu1 %v692_v5  ;;  %s906_s22 = smov (!%p268_p4, %s793_s22), 1 }
   0xe   : > { %s611_s12 = sshll.u32 %s904_s29, 3  ;;  %697 = vmatprep.subr.bf16.mxu0 %v696_v8  ;;  %722 = vmatprep.subr.bf16.mxu1 %v696_v8  ;;  %s614_s29 = sshll.u32 %s906_s22, 3 }
   0xf   : > { %s833_s23 = scalar_lea.vmem %s896_s0, %s611_s12  ;;  %s266_s24 = scalar_lea.vmem %s900_s4, %s611_s12 }
  0x10   : > { %v276_v12 = vld [vmem:[%s833_s23] sm:$0xff]  ;;  %v277_v30 = vld [vmem:[%s833_s23 + $0x8] sm:$0xff]  ;;  %v278_v33 = vld [vmem:[%s833_s23 + $0x10] sm:$0xff]  ;;  %s271_s26 = scalar_lea.vmem %s901_s5, %s614_s29  ;;  %s275_s30 = scalar_lea.vmem %s902_s6, %s614_s29 }
  0x11   : > { %v291_v14 = vmul.f32 %v616_v9, %v276_v12  ;;  %v280_v15 = vld [vmem:[%s833_s23 + $0x20] sm:$0xff]  ;;  %699 = vmatpush3.bf16.msra.mxu0 %v696_v8  ;;  %730 = vmatpush3.bf16.msra.mxu1 %v696_v8  ;;  %v281_v31 = vld [vmem:[%s833_s23 + $0x28] sm:$0xff]  ;;  %v282_v34 = vld [vmem:[%s833_s23 + $0x30] sm:$0xff]  ;;  %v292_v37 = vmul.f32 %v616_v9, %v277_v30  ;;  %v293_v39 = vmul.f32 %v616_v9, %v278_v33 }
  0x12   : > { %v295_v17 = vmul.f32 %v616_v9, %v280_v15  ;;  %701 = vmatprep.subr.bf16.mxu0 %v700_v16  ;;  %723 = vmatprep.subr.bf16.mxu1 %v700_v16  ;;  %v296_v38 = vmul.f32 %v616_v9, %v281_v31  ;;  %v279_v40 = vld [vmem:[%s833_s23 + $0x18] sm:$0xff]  ;;  %v297_v41 = vmul.f32 %v616_v9, %v282_v34 }
  0x13   : > { %v306_v20 = vadd.f32 %v839_v13, %v291_v14  ;;  %v283_v42 = vld [vmem:[%s833_s23 + $0x38] sm:$0xff]  ;;  %v307_v44 = vadd.f32 %v839_v13, %v292_v37  ;;  %v294_v45 = vmul.f32 %v616_v9, %v279_v40  ;;  %v308_v48 = vadd.f32 %v839_v13, %v293_v39 }
  0x14   : > { %v310_v21 = vadd.f32 %v839_v13, %v295_v17  ;;  %v311_v46 = vadd.f32 %v839_v13, %v296_v38  ;;  %v298_v47 = vmul.f32 %v616_v9, %v283_v42  ;;  %v312_v49 = vadd.f32 %v839_v13, %v297_v41 }
  0x15   : > { %v314_v22 = vmax.f32 %v306_v20, 0.0  ;;  %703 = vmatpush3.bf16.msra.mxu0 %v700_v16  ;;  %731 = vmatpush3.bf16.msra.mxu1 %v700_v16  ;;  %v315_v50 = vmax.f32 %v307_v44, 0.0  ;;  %v309_v51 = vadd.f32 %v839_v13, %v294_v45  ;;  %v316_v54 = vmax.f32 %v308_v48, 0.0 }
  0x16   : > { %v318_v24 = vmax.f32 %v310_v21, 0.0  ;;  %705 = vmatprep.subr.bf16.mxu0 %v704_v23  ;;  %724 = vmatprep.subr.bf16.mxu1 %v704_v23  ;;  %v319_v52 = vmax.f32 %v311_v46, 0.0  ;;  %v313_v53 = vadd.f32 %v839_v13, %v298_v47  ;;  %v320_v55 = vmax.f32 %v312_v49, 0.0 }
  0x17   : > { %676 = vmatprep.mubr.f32.mxu0 %v314_v22  ;;  %v317_v56 = vmax.f32 %v309_v51, 0.0 }
  0x18   : > { %682 = vmatprep.mubr.f32.mxu1 %v318_v24  ;;  %v321_v57 = vmax.f32 %v313_v53, 0.0 }
  0x19   : > { %707 = vmatpush3.bf16.msra.mxu0 %v704_v23  ;;  %732 = vmatpush3.bf16.msra.mxu1 %v704_v23 }
  0x1a   : > { %709 = vmatprep.subr.bf16.mxu0 %v708_v27  ;;  %725 = vmatprep.subr.bf16.mxu1 %v708_v27 }
  0x1d   : > { %711 = vmatpush3.bf16.msra.mxu0 %v708_v27  ;;  %733 = vmatpush3.bf16.msra.mxu1 %v708_v27 }
  0x1e   : > { %713 = vmatprep.subr.bf16.mxu0 %v712_v32  ;;  %726 = vmatprep.subr.bf16.mxu1 %v712_v32 }
  0x21   : > { %715 = vmatpush3.bf16.msra.mxu0 %v712_v32  ;;  %734 = vmatpush3.bf16.msra.mxu1 %v712_v32 }
  0x22   : > { %717 = vmatprep.subr.bf16.mxu0 %v716_v43  ;;  %727 = vmatprep.subr.bf16.mxu1 %v716_v43 }
  0x25   : > { %719 = vmatpush3.bf16.msra.mxu0 %v716_v43  ;;  %735 = vmatpush3.bf16.msra.mxu1 %v716_v43 }
  0x28   : > { %677 = vmatmul.mubr.f32.vlgmr.msra.gmra.mrb[0].mxu0 %v315_v50  ;;  %683 = vmatmul.mubr.f32.vlgmr.msra.gmra.mrb[0].mxu1 %v319_v52 }
  0x29   : > { %679 = vmatprep.mubr.f32.mxu0 %v316_v54  ;;  %685 = vmatprep.mubr.f32.mxu1 %v320_v55 }
  0x2c   : > { %680 = vmatmul.mubr.f32.gmra.mrb[2].mxu0 %v317_v56  ;;  %686 = vmatmul.mubr.f32.gmra.mrb[2].mxu1 %v321_v57 }
  0xfb   : > { %v678_v58 = vpop.f32.mrb[0].mxu0  ;;  %v684_v59 = vpop.f32.mrb[0].mxu1 }
  0xfc   : > { %444 = vst [vmem:[%s266_s24 + $0x8] sm:$0xff] %v678_v58  ;;  %v466_v60 = vmul.f32 %v678_v58, %v678_v58  ;;  %v404_v61 = vpop.f32.mrb[1].mxu0  ;;  %448 = vst [vmem:[%s266_s24 + $0x28] sm:$0xff] %v684_v59  ;;  %v424_v62 = vpop.f32.mrb[1].mxu1  ;;  %v470_v14 = vmul.f32 %v684_v59, %v684_v59 }
  0xfd   : > { %443 = vst [vmem:[%s266_s24] sm:$0xff] %v404_v61  ;;  %v451_v63 = vadd.f32 %v678_v58, %v404_v61  ;;  %v465_v0 = vmul.f32 %v404_v61, %v404_v61  ;;  %447 = vst [vmem:[%s266_s24 + $0x20] sm:$0xff] %v424_v62  ;;  %v469_v11 = vmul.f32 %v424_v62, %v424_v62 }
  0xff   : > { %v473_v1 = vadd.f32 %v466_v60, %v465_v0  ;;  %v681_v2 = vpop.f32.mrb[2].mxu0  ;;  %v687_v3 = vpop.f32.mrb[2].mxu1 }
 0x100   : > { %446 = vst [vmem:[%s266_s24 + $0x18] sm:$0xff] %v681_v2  ;;  %v414_v4 = vpop.f32.mrb[3].mxu0  ;;  %450 = vst [vmem:[%s266_s24 + $0x38] sm:$0xff] %v687_v3  ;;  %v434_v5 = vpop.f32.mrb[3].mxu1  ;;  %v468_v8 = vmul.f32 %v681_v2, %v681_v2  ;;  %v472_v20 = vmul.f32 %v687_v3, %v687_v3 }
 0x101   : > { %445 = vst [vmem:[%s266_s24 + $0x10] sm:$0xff] %v414_v4  ;;  %v452_v6 = vadd.f32 %v451_v63, %v414_v4  ;;  %v467_v7 = vmul.f32 %v414_v4, %v414_v4  ;;  %449 = vst [vmem:[%s266_s24 + $0x30] sm:$0xff] %v434_v5  ;;  %v471_v17 = vmul.f32 %v434_v5, %v434_v5 }
 0x103   : > { %v453_v9 = vadd.f32 %v681_v2, %v452_v6  ;;  %v474_v10 = vadd.f32 %v473_v1, %v467_v7 }
 0x105   : > { %v475_v12 = vadd.f32 %v474_v10, %v468_v8  ;;  %v454_v13 = vadd.f32 %v453_v9, %v424_v62 }
 0x107   : > { %v476_v15 = vadd.f32 %v475_v12, %v469_v11  ;;  %v455_v16 = vadd.f32 %v684_v59, %v454_v13 }
 0x109   : > { %v456_v18 = vadd.f32 %v455_v16, %v434_v5  ;;  %v477_v19 = vadd.f32 %v476_v15, %v470_v14 }
 0x10b   : > { %v457_v21 = vadd.f32 %v687_v3, %v456_v18  ;;  %v478_v22 = vadd.f32 %v477_v19, %v471_v17 }
 0x10d   : > { %v458_v23 = vrot.slane %v457_v21, 4  ;;  %v479_v24 = vadd.f32 %v478_v22, %v472_v20 }
 0x10f   : > { %v459_v25 = vadd.f32 %v458_v23, %v457_v21  ;;  %v480_v26 = vrot.slane %v479_v24, 4 }
 0x111   : > { %v460_v27 = vrot.slane %v459_v25, 2  ;;  %v481_v28 = vadd.f32 %v480_v26, %v479_v24 }
 0x113   : > { %v461_v29 = vadd.f32 %v460_v27, %v459_v25  ;;  %v482_v30 = vrot.slane %v481_v28, 2 }
 0x115   : > { %v462_v31 = vrot.slane %v461_v29, 1  ;;  %v483_v32 = vadd.f32 %v482_v30, %v481_v28 }
 0x117   : > { %v463_v33 = vadd.f32 %v462_v31, %v461_v29  ;;  %v484_v34 = vrot.slane %v483_v32, 1 }
 0x119   : > { %464 = vst [vmem:[%s271_s26] sm:$0xff] %v463_v33  ;;  %v485_v35 = vadd.f32 %v484_v34, %v483_v32 }
 0x11b   : > { %486 = vst [vmem:[%s275_s30] sm:$0xff] %v485_v35 }
 0x11c PF: > { %s17_s21 = sadd.s32 1, %s750_s21  }
 0x11d   : > { %p14_p5 = scmp.ge.s32.totalorder %s17_s21, 4  }
 0x11f   :  { %16 = sbr.rel (!%p14_p5) target bundleno = 1 (0x1), region = 90 }

// kernel: bottleneck_forward.9
= control target key start
LH: loop header
LB: loop body
LE: loop exit
PB: predicated region body
PF: predicated region fallthrough
CT: control target
= control target key end

     0   :  { %s325_s12 = smov 0   ;;  %s348_s0 = inlined_call_operand.vmem [shape: f32[128,128], index: 0, kind: input, shape index: {}]   ;;  %s349_s1 = inlined_call_operand.vmem [shape: f32[1,128], index: 1, kind: input, shape index: {}]   ;;  %s350_s2 = inlined_call_operand.vmem [shape: f32[1,128], index: 2, kind: input, shape index: {}]   ;;  %s351_s3 = inlined_call_operand.vmem [shape: f32[128,128], index: 3, kind: output, shape index: {}]  }
   0x1 LB: > { %s276_s13 = sadd.s32 4294967295, %s303_s12   ;;  %p280_p0 = scmp.ge.s32.totalorder %s303_s12, 1  ;;  %s303_s12 = sphi %s325_s12, %s13_s12  }
   0x2   : > { %p138_p1 = scmp.lt.s32.totalorder %s303_s12, 3 }
   0x4   : > { %p139_p2 = pnand %p280_p0, %p138_p1 }
   0x5   : > { %s281_s14 = sshll.u32 (!%p139_p2), %s276_s13, 3  ;;  %v285_v0 = vld [vmem:[%s349_s1] ss:$0 sm:$0xff] (!%p139_p2) }
   0x6   : > { %142 = sbr.rel (%p139_p2) target bundleno = 25 (0x19), region = 32  ;;  %p163_p3 = scmp.lt.s32.totalorder (!%p139_p2), %s281_s14, 15  ;;  %v286_v1 = vld [vmem:[%s350_s2] ss:$0 sm:$0xff] (!%p139_p2) }
   0xd   : > { %s353_s14 = smov (!%p163_p3, %s281_s14), 15 }
   0xe   : > { %s282_s15 = sshll.u32 %s353_s14, 3 }
   0xf   : > { %s166_s20 = scalar_lea.vmem %s348_s0, %s282_s15  ;;  %s172_s25 = scalar_lea.vmem %s351_s3, %s282_s15 }
  0x10   : > { %v174_v2 = vld [vmem:[%s166_s20] sm:$0xff]  ;;  %v175_v3 = vld [vmem:[%s166_s20 + $0x8] sm:$0xff]  ;;  %v176_v4 = vld [vmem:[%s166_s20 + $0x10] sm:$0xff] }
  0x11   : > { %v189_v5 = vmul.f32 %v285_v0, %v174_v2  ;;  %v190_v6 = vmul.f32 %v285_v0, %v175_v3  ;;  %v191_v7 = vmul.f32 %v285_v0, %v176_v4  ;;  %v177_v8 = vld [vmem:[%s166_s20 + $0x18] sm:$0xff]  ;;  %v178_v9 = vld [vmem:[%s166_s20 + $0x20] sm:$0xff]  ;;  %v179_v10 = vld [vmem:[%s166_s20 + $0x28] sm:$0xff] }
  0x12   : > { %v192_v11 = vmul.f32 %v285_v0, %v177_v8  ;;  %v193_v12 = vmul.f32 %v285_v0, %v178_v9  ;;  %v194_v13 = vmul.f32 %v285_v0, %v179_v10  ;;  %v180_v14 = vld [vmem:[%s166_s20 + $0x30] sm:$0xff]  ;;  %v181_v15 = vld [vmem:[%s166_s20 + $0x38] sm:$0xff] }
  0x13   : > { %v204_v16 = vadd.f32 %v286_v1, %v189_v5  ;;  %v205_v17 = vadd.f32 %v286_v1, %v190_v6  ;;  %v206_v18 = vadd.f32 %v286_v1, %v191_v7  ;;  %v195_v19 = vmul.f32 %v285_v0, %v180_v14 }
  0x14   : > { %v207_v20 = vadd.f32 %v286_v1, %v192_v11  ;;  %v208_v21 = vadd.f32 %v286_v1, %v193_v12  ;;  %v209_v22 = vadd.f32 %v286_v1, %v194_v13  ;;  %v196_v23 = vmul.f32 %v285_v0, %v181_v15 }
  0x15   : > { %212 = vst [vmem:[%s172_s25] sm:$0xff] %v204_v16  ;;  %213 = vst [vmem:[%s172_s25 + $0x8] sm:$0xff] %v205_v17  ;;  %v210_v24 = vadd.f32 %v286_v1, %v195_v19 }
  0x16   : > { %214 = vst [vmem:[%s172_s25 + $0x10] sm:$0xff] %v206_v18  ;;  %215 = vst [vmem:[%s172_s25 + $0x18] sm:$0xff] %v207_v20  ;;  %v211_v25 = vadd.f32 %v286_v1, %v196_v23 }
  0x17   : > { %216 = vst [vmem:[%s172_s25 + $0x20] sm:$0xff] %v208_v21  ;;  %217 = vst [vmem:[%s172_s25 + $0x28] sm:$0xff] %v209_v22 }
  0x18   : > { %218 = vst [vmem:[%s172_s25 + $0x30] sm:$0xff] %v210_v24  ;;  %219 = vst [vmem:[%s172_s25 + $0x38] sm:$0xff] %v211_v25 }
  0x19 PF: > { %s13_s12 = sadd.s32 1, %s303_s12  }
  0x1a   : > { %p10_p4 = scmp.ge.s32.totalorder %s13_s12, 4  }
  0x1c   :  { %12 = sbr.rel (!%p10_p4) target bundleno = 1 (0x1), region = 62 }

// kernel: bottleneck_forward.7
= control target key start
LH: loop header
LB: loop body
LE: loop exit
PB: predicated region body
PF: predicated region fallthrough
CT: control target
= control target key end

     0   :  { %s1651_s15 = smov 0   ;;  %s2212_s0 = inlined_call_operand.vmem [shape: f32[128,1152], index: 0, kind: input, shape index: {}]   ;;  %s2213_s1 = inlined_call_operand.vmem [shape: f32[1152,128], index: 1, kind: input, shape index: {}]   ;;  %s2214_s2 = inlined_call_operand.vmem [shape: f32[128,128], index: 2, kind: output, shape index: {0}]   ;;  %s2215_s3 = inlined_call_operand.vmem [shape: f32[16,128], index: 3, kind: output, shape index: {1}]   ;;  %s2216_s4 = inlined_call_operand.vmem [shape: f32[16,128], index: 4, kind: output, shape index: {2}]  }
   0x1 LB: > { %s1657_s16 = sadd.s32 4294967295, %s1624_s15   ;;  %p1132_p0 = scmp.ge.s32.totalorder %s1624_s15, 1  ;;  %s1624_s15 = sphi %s1651_s15, %s15_s15  }
   0x2   : > { %p169_p1 = scmp.lt.s32.totalorder %s1624_s15, 3 }
   0x4   : > { %p170_p2 = pnand %p1132_p0, %p169_p1 }
   0x5   : > { %v313_v0 = vld [vmem:[%s2213_s1 + $0x80] sm:$0xff] (!%p170_p2)  ;;  %v314_v1 = vld [vmem:[%s2213_s1 + $0x88] sm:$0xff] (!%p170_p2)  ;;  %v315_v11 = vld [vmem:[%s2213_s1 + $0x90] sm:$0xff] (!%p170_p2)  ;;  %s1133_s17 = sshll.u32 (!%p170_p2), %s1657_s16, 3  ;;  %p217_p4 = scmp.lt.s32.totalorder (!%p170_p2), %s1657_s16, 1 }
   0x6   : > { %173 = sbr.rel (%p170_p2) target bundleno = 351 (0x15f), region = 28  ;;  %v345_v2 = vld [vmem:[%s2213_s1 + $0x180] sm:$0xff] (!%p170_p2)  ;;  %v1433_v3 = vpack.c.bf16 (!%p170_p2), %v314_v1, %v313_v0  ;;  %v346_v4 = vld [vmem:[%s2213_s1 + $0x188] sm:$0xff] (!%p170_p2)  ;;  %v316_v13 = vld [vmem:[%s2213_s1 + $0x98] sm:$0xff] (!%p170_p2)  ;;  %p1727_p3 = scmp.lt.s32.totalorder (!%p170_p2), %s1133_s17, 15 }
   0x7   : > { %v297_v5 = vld [vmem:[%s2213_s1] sm:$0xff] (!%p170_p2)  ;;  %v298_v6 = vld [vmem:[%s2213_s1 + $0x8] sm:$0xff] (!%p170_p2)  ;;  %v1465_v7 = vpack.c.bf16 (!%p170_p2), %v346_v4, %v345_v2  ;;  %v347_v14 = vld [vmem:[%s2213_s1 + $0x190] sm:$0xff] (!%p170_p2)  ;;  %v1437_v16 = vpack.c.bf16 (!%p170_p2), %v316_v13, %v315_v11 }
   0x8   : > { %v1435_v8 = vpack.c.bf16 (!%p170_p2), %v298_v6, %v297_v5  ;;  %v329_v9 = vld [vmem:[%s2213_s1 + $0x100] sm:$0xff] (!%p170_p2)  ;;  %v330_v10 = vld [vmem:[%s2213_s1 + $0x108] sm:$0xff] (!%p170_p2)  ;;  %1434 = vmatprep.subr.bf16.mxu0 (!%p170_p2), %v1433_v3  ;;  %v348_v15 = vld [vmem:[%s2213_s1 + $0x198] sm:$0xff] (!%p170_p2) }
   0x9   : > { %v1467_v12 = vpack.c.bf16 (!%p170_p2), %v330_v10, %v329_v9  ;;  %1466 = vmatprep.subr.bf16.mxu1 (!%p170_p2), %v1465_v7  ;;  %v1469_v17 = vpack.c.bf16 (!%p170_p2), %v348_v15, %v347_v14  ;;  %v299_v18 = vld [vmem:[%s2213_s1 + $0x10] sm:$0xff] (!%p170_p2)  ;;  %v300_v19 = vld [vmem:[%s2213_s1 + $0x18] sm:$0xff] (!%p170_p2)  ;;  %v317_v23 = vld [vmem:[%s2213_s1 + $0xa0] sm:$0xff] (!%p170_p2) }
   0xa   : > { %1436 = vmatpush3.bf16.msra.mxu0 (!%p170_p2), %v1435_v8  ;;  %v331_v20 = vld [vmem:[%s2213_s1 + $0x110] sm:$0xff] (!%p170_p2)  ;;  %v1439_v21 = vpack.c.bf16 (!%p170_p2), %v300_v19, %v299_v18  ;;  %v332_v22 = vld [vmem:[%s2213_s1 + $0x118] sm:$0xff] (!%p170_p2)  ;;  %v318_v24 = vld [vmem:[%s2213_s1 + $0xa8] sm:$0xff] (!%p170_p2) }
   0xb   : > { %1468 = vmatpush3.bf16.msra.mxu1 (!%p170_p2), %v1467_v12  ;;  %1438 = vmatprep.subr.bf16.mxu0 (!%p170_p2), %v1437_v16  ;;  %v1471_v25 = vpack.c.bf16 (!%p170_p2), %v332_v22, %v331_v20  ;;  %v1441_v26 = vpack.c.bf16 (!%p170_p2), %v318_v24, %v317_v23  ;;  %v349_v27 = vld [vmem:[%s2213_s1 + $0x1a0] sm:$0xff] (!%p170_p2)  ;;  %v350_v28 = vld [vmem:[%s2213_s1 + $0x1a8] sm:$0xff] (!%p170_p2)  ;;  %v319_v35 = vld [vmem:[%s2213_s1 + $0xb0] sm:$0xff] (!%p170_p2) }
   0xc   : > { %1470 = vmatprep.subr.bf16.mxu1 (!%p170_p2), %v1469_v17  ;;  %v301_v29 = vld [vmem:[%s2213_s1 + $0x20] sm:$0xff] (!%p170_p2)  ;;  %v1473_v30 = vpack.c.bf16 (!%p170_p2), %v350_v28, %v349_v27  ;;  %v302_v31 = vld [vmem:[%s2213_s1 + $0x28] sm:$0xff] (!%p170_p2)  ;;  %v320_v36 = vld [vmem:[%s2213_s1 + $0xb8] sm:$0xff] (!%p170_p2) }
   0xd   : > { %v333_v32 = vld [vmem:[%s2213_s1 + $0x120] sm:$0xff]  ;;  %v334_v33 = vld [vmem:[%s2213_s1 + $0x128] sm:$0xff]  ;;  %v1443_v34 = vpack.c.bf16 %v302_v31, %v301_v29  ;;  %v351_v37 = vld [vmem:[%s2213_s1 + $0x1b0] sm:$0xff]  ;;  %v1445_v39 = vpack.c.bf16 %v320_v36, %v319_v35  ;;  %s2219_s17 = smov (!%p1727_p3, %s1133_s17), 15  ;;  %s2221_s16 = smov (!%p217_p4, %s1657_s16), 1 }
   0xe   : > { %1440 = vmatpush3.bf16.msra.mxu0 %v1439_v21  ;;  %v1475_v38 = vpack.c.bf16 %v334_v33, %v333_v32  ;;  %v352_v40 = vld [vmem:[%s2213_s1 + $0x1b8] sm:$0xff]  ;;  %v303_v41 = vld [vmem:[%s2213_s1 + $0x30] sm:$0xff]  ;;  %v321_v46 = vld [vmem:[%s2213_s1 + $0xc0] sm:$0xff]  ;;  %s1609_s7 = smul.u32 72, %s2219_s17 }
   0xf   : > { %1472 = vmatpush3.bf16.msra.mxu1 %v1471_v25  ;;  %1442 = vmatprep.subr.bf16.mxu0 %v1441_v26  ;;  %v304_v42 = vld [vmem:[%s2213_s1 + $0x38] sm:$0xff]  ;;  %v1477_v43 = vpack.c.bf16 %v352_v40, %v351_v37  ;;  %v335_v44 = vld [vmem:[%s2213_s1 + $0x130] sm:$0xff]  ;;  %v322_v47 = vld [vmem:[%s2213_s1 + $0xc8] sm:$0xff] }
  0x10   : > { %1474 = vmatprep.subr.bf16.mxu1 %v1473_v30  ;;  %v336_v45 = vld [vmem:[%s2213_s1 + $0x138] sm:$0xff]  ;;  %v353_v48 = vld [vmem:[%s2213_s1 + $0x1c0] sm:$0xff]  ;;  %v354_v49 = vld [vmem:[%s2213_s1 + $0x1c8] sm:$0xff]  ;;  %v1447_v50 = vpack.c.bf16 %v304_v42, %v303_v41  ;;  %v1449_v52 = vpack.c.bf16 %v322_v47, %v321_v46  ;;  %s1828_s29 = scalar_lea.vmem %s2212_s0, %s1609_s7 }
  0x11   : > { %v1479_v51 = vpack.c.bf16 %v336_v45, %v335_v44  ;;  %v305_v53 = vld [vmem:[%s2213_s1 + $0x40] sm:$0xff]  ;;  %v306_v54 = vld [vmem:[%s2213_s1 + $0x48] sm:$0xff]  ;;  %v1481_v56 = vpack.c.bf16 %v354_v49, %v353_v48  ;;  %v323_v58 = vld [vmem:[%s2213_s1 + $0xd0] sm:$0xff] }
  0x12   : > { %1444 = vmatpush3.bf16.msra.mxu0 %v1443_v34  ;;  %v337_v55 = vld [vmem:[%s2213_s1 + $0x140] sm:$0xff]  ;;  %v338_v57 = vld [vmem:[%s2213_s1 + $0x148] sm:$0xff]  ;;  %v324_v59 = vld [vmem:[%s2213_s1 + $0xd8] sm:$0xff]  ;;  %v1451_v62 = vpack.c.bf16 %v306_v54, %v305_v53 }
  0x13   : > { %1476 = vmatpush3.bf16.msra.mxu1 %v1475_v38  ;;  %1446 = vmatprep.subr.bf16.mxu0 %v1445_v39  ;;  %v355_v60 = vld [vmem:[%s2213_s1 + $0x1d0] sm:$0xff]  ;;  %v356_v61 = vld [vmem:[%s2213_s1 + $0x1d8] sm:$0xff]  ;;  %v1483_v63 = vpack.c.bf16 %v338_v57, %v337_v55  ;;  %v1453_v0 = vpack.c.bf16 %v324_v59, %v323_v58  ;;  %v325_v6 = vld [vmem:[%s2213_s1 + $0xe0] sm:$0xff] }
  0x14   : > { %1478 = vmatprep.subr.bf16.mxu1 %v1477_v43  ;;  %v307_v1 = vld [vmem:[%s2213_s1 + $0x50] sm:$0xff]  ;;  %v308_v2 = vld [vmem:[%s2213_s1 + $0x58] sm:$0xff]  ;;  %v1485_v4 = vpack.c.bf16 %v356_v61, %v355_v60  ;;  %v326_v7 = vld [vmem:[%s2213_s1 + $0xe8] sm:$0xff] }
  0x15   : > { %v339_v3 = vld [vmem:[%s2213_s1 + $0x150] sm:$0xff]  ;;  %v340_v5 = vld [vmem:[%s2213_s1 + $0x158] sm:$0xff]  ;;  %v357_v8 = vld [vmem:[%s2213_s1 + $0x1e0] sm:$0xff]  ;;  %v1455_v10 = vpack.c.bf16 %v308_v2, %v307_v1  ;;  %v1457_v14 = vpack.c.bf16 %v326_v7, %v325_v6 }
  0x16   : > { %1448 = vmatpush3.bf16.msra.mxu0 %v1447_v50  ;;  %v358_v9 = vld [vmem:[%s2213_s1 + $0x1e8] sm:$0xff]  ;;  %v309_v11 = vld [vmem:[%s2213_s1 + $0x60] sm:$0xff]  ;;  %v1487_v13 = vpack.c.bf16 %v340_v5, %v339_v3  ;;  %v228_v17 = vld [vmem:[%s1828_s29 + $0x18] sm:$0xff] }
  0x17   : > { %1480 = vmatpush3.bf16.msra.mxu1 %v1479_v51  ;;  %1450 = vmatprep.subr.bf16.mxu0 %v1449_v52  ;;  %v310_v12 = vld [vmem:[%s2213_s1 + $0x68] sm:$0xff]  ;;  %v341_v15 = vld [vmem:[%s2213_s1 + $0x160] sm:$0xff]  ;;  %v1489_v18 = vpack.c.bf16 %v358_v9, %v357_v8  ;;  %v327_v20 = vld [vmem:[%s2213_s1 + $0xf0] sm:$0xff] }
  0x18   : > { %1482 = vmatprep.subr.bf16.mxu1 %v1481_v56  ;;  %v226_v16 = vld [vmem:[%s1828_s29 + $0x8] sm:$0xff]  ;;  %v328_v21 = vld [vmem:[%s2213_s1 + $0xf8] sm:$0xff]  ;;  %v359_v22 = vld [vmem:[%s2213_s1 + $0x1f0] sm:$0xff]  ;;  %610 = vmatprep.mubr.f32.mxu1 %v228_v17  ;;  %v1459_v24 = vpack.c.bf16 %v310_v12, %v309_v11 }
  0x19   : > { %v342_v19 = vld [vmem:[%s2213_s1 + $0x168] sm:$0xff]  ;;  %505 = vmatprep.mubr.f32.mxu0 %v226_v16  ;;  %v360_v23 = vld [vmem:[%s2213_s1 + $0x1f8] sm:$0xff]  ;;  %v1461_v26 = vpack.c.bf16 %v328_v21, %v327_v20  ;;  %v311_v27 = vld [vmem:[%s2213_s1 + $0x70] sm:$0xff] }
  0x1a   : > { %1452 = vmatpush3.bf16.msra.mxu0 %v1451_v62  ;;  %v1491_v25 = vpack.c.bf16 %v342_v19, %v341_v15  ;;  %v312_v28 = vld [vmem:[%s2213_s1 + $0x78] sm:$0xff]  ;;  %v343_v29 = vld [vmem:[%s2213_s1 + $0x170] sm:$0xff]  ;;  %v1493_v30 = vpack.c.bf16 %v360_v23, %v359_v22  ;;  %v377_v32 = vld [vmem:[%s2213_s1 + $0x280] sm:$0xff] }
  0x1b   : > { %1484 = vmatpush3.bf16.msra.mxu1 %v1483_v63  ;;  %1454 = vmatprep.subr.bf16.mxu0 %v1453_v0  ;;  %v344_v31 = vld [vmem:[%s2213_s1 + $0x178] sm:$0xff]  ;;  %v378_v33 = vld [vmem:[%s2213_s1 + $0x288] sm:$0xff]  ;;  %v409_v34 = vld [vmem:[%s2213_s1 + $0x380] sm:$0xff]  ;;  %v1463_v36 = vpack.c.bf16 %v312_v28, %v311_v27 }
  0x1c   : > { %1486 = vmatprep.subr.bf16.mxu1 %v1485_v4  ;;  %v410_v35 = vld [vmem:[%s2213_s1 + $0x388] sm:$0xff]  ;;  %v1495_v37 = vpack.c.bf16 %v344_v31, %v343_v29  ;;  %v1497_v38 = vpack.c.bf16 %v378_v33, %v377_v32  ;;  %v361_v39 = vld [vmem:[%s2213_s1 + $0x200] sm:$0xff]  ;;  %v379_v44 = vld [vmem:[%s2213_s1 + $0x290] sm:$0xff] }
  0x1d   : > { %v362_v40 = vld [vmem:[%s2213_s1 + $0x208] sm:$0xff]  ;;  %v1529_v41 = vpack.c.bf16 %v410_v35, %v409_v34  ;;  %v393_v42 = vld [vmem:[%s2213_s1 + $0x300] sm:$0xff]  ;;  %v380_v45 = vld [vmem:[%s2213_s1 + $0x298] sm:$0xff] }
  0x1e   : > { %1456 = vmatpush3.bf16.msra.mxu0 %v1455_v10  ;;  %v394_v43 = vld [vmem:[%s2213_s1 + $0x308] sm:$0xff]  ;;  %v225_v46 = vld [vmem:[%s1828_s29] sm:$0xff]  ;;  %v1499_v47 = vpack.c.bf16 %v362_v40, %v361_v39  ;;  %v411_v48 = vld [vmem:[%s2213_s1 + $0x390] sm:$0xff]  ;;  %v1501_v55 = vpack.c.bf16 %v380_v45, %v379_v44 }
  0x1f   : > { %1488 = vmatpush3.bf16.msra.mxu1 %v1487_v13  ;;  %1458 = vmatprep.subr.bf16.mxu0 %v1457_v14  ;;  %v412_v49 = vld [vmem:[%s2213_s1 + $0x398] sm:$0xff]  ;;  %v227_v50 = vld [vmem:[%s1828_s29 + $0x10] sm:$0xff]  ;;  %v1531_v51 = vpack.c.bf16 %v394_v43, %v393_v42  ;;  %v237_v58 = vld [vmem:[%s1828_s29 + $0x60] sm:$0xff] }
  0x20   : > { %1490 = vmatprep.subr.bf16.mxu1 %v1489_v18  ;;  %v363_v52 = vld [vmem:[%s2213_s1 + $0x210] sm:$0xff]  ;;  %v364_v53 = vld [vmem:[%s2213_s1 + $0x218] sm:$0xff]  ;;  %v1533_v59 = vpack.c.bf16 %v412_v49, %v411_v48  ;;  %v381_v60 = vld [vmem:[%s2213_s1 + $0x2a0] sm:$0xff] }
  0x21   : > { %v235_v54 = vld [vmem:[%s1828_s29 + $0x50] sm:$0xff]  ;;  %v396_v57 = vld [vmem:[%s2213_s1 + $0x318] sm:$0xff]  ;;  %v382_v61 = vld [vmem:[%s2213_s1 + $0x2a8] sm:$0xff]  ;;  %v1503_v63 = vpack.c.bf16 %v364_v53, %v363_v52 }
  0x22   : > { %1460 = vmatpush3.bf16.msra.mxu0 %v1459_v24  ;;  %v395_v56 = vld [vmem:[%s2213_s1 + $0x310] sm:$0xff]  ;;  %v234_v62 = vld [vmem:[%s1828_s29 + $0x48] sm:$0xff]  ;;  %v413_v0 = vld [vmem:[%s2213_s1 + $0x3a0] sm:$0xff]  ;;  %v1505_v7 = vpack.c.bf16 %v382_v61, %v381_v60 }
  0x23   : > { %1492 = vmatpush3.bf16.msra.mxu1 %v1491_v25  ;;  %1462 = vmatprep.subr.bf16.mxu0 %v1461_v26  ;;  %v414_v1 = vld [vmem:[%s2213_s1 + $0x3a8] sm:$0xff]  ;;  %v236_v2 = vld [vmem:[%s1828_s29 + $0x58] sm:$0xff]  ;;  %v1535_v3 = vpack.c.bf16 %v396_v57, %v395_v56  ;;  %v365_v4 = vld [vmem:[%s2213_s1 + $0x220] sm:$0xff] }
  0x24   : > { %1494 = vmatprep.subr.bf16.mxu1 %v1493_v30  ;;  %v366_v5 = vld [vmem:[%s2213_s1 + $0x228] sm:$0xff]  ;;  %v244_v6 = vld [vmem:[%s1828_s29 + $0x98] sm:$0xff]  ;;  %v397_v8 = vld [vmem:[%s2213_s1 + $0x320] sm:$0xff]  ;;  %v1537_v11 = vpack.c.bf16 %v414_v1, %v413_v0 }
  0x25   : > { %v398_v9 = vld [vmem:[%s2213_s1 + $0x328] sm:$0xff]  ;;  %v383_v12 = vld [vmem:[%s2213_s1 + $0x2b0] sm:$0xff]  ;;  %v384_v13 = vld [vmem:[%s2213_s1 + $0x2b8] sm:$0xff]  ;;  %v1507_v15 = vpack.c.bf16 %v366_v5, %v365_v4 }
  0x26   : > { %1464 = vmatpush3.bf16.msra.mxu0 %v1463_v36  ;;  %v246_v10 = vld [vmem:[%s1828_s29 + $0xa8] sm:$0xff]  ;;  %v243_v14 = vld [vmem:[%s1828_s29 + $0x90] sm:$0xff]  ;;  %v416_v17 = vld [vmem:[%s2213_s1 + $0x3b8] sm:$0xff]  ;;  %v1539_v19 = vpack.c.bf16 %v398_v9, %v397_v8  ;;  %v1509_v23 = vpack.c.bf16 %v384_v13, %v383_v12 }
  0x27   : > { %1496 = vmatpush3.bf16.msra.mxu1 %v1495_v37  ;;  %1498 = vmatprep.subr.bf16.mxu0 %v1497_v38  ;;  %v415_v16 = vld [vmem:[%s2213_s1 + $0x3b0] sm:$0xff]  ;;  %v245_v18 = vld [vmem:[%s1828_s29 + $0xa0] sm:$0xff]  ;;  %v368_v21 = vld [vmem:[%s2213_s1 + $0x238] sm:$0xff] }
  0x28   : > { %1530 = vmatprep.subr.bf16.mxu1 %v1529_v41  ;;  %v367_v20 = vld [vmem:[%s2213_s1 + $0x230] sm:$0xff]  ;;  %v253_v22 = vld [vmem:[%s1828_s29 + $0xe0] sm:$0xff]  ;;  %v400_v25 = vld [vmem:[%s2213_s1 + $0x338] sm:$0xff]  ;;  %v1541_v27 = vpack.c.bf16 %v416_v17, %v415_v16 }
  0x29   : > { %506 = vmatmul.mubr.f32.vlgmr.msra.gmra.mrb[0].mxu0 %v225_v46  ;;  %v399_v24 = vld [vmem:[%s2213_s1 + $0x330] sm:$0xff]  ;;  %v385_v28 = vld [vmem:[%s2213_s1 + $0x2c0] sm:$0xff]  ;;  %v386_v29 = vld [vmem:[%s2213_s1 + $0x2c8] sm:$0xff]  ;;  %v1511_v31 = vpack.c.bf16 %v368_v21, %v367_v20 }
  0x2a   : > { %611 = vmatmul.mubr.f32.vlgmr.msra.gmra.mrb[0].mxu1 %v227_v50  ;;  %1500 = vmatpush3.bf16.msra.mxu0 %v1499_v47  ;;  %v255_v26 = vld [vmem:[%s1828_s29 + $0xf0] sm:$0xff]  ;;  %v252_v30 = vld [vmem:[%s1828_s29 + $0xd8] sm:$0xff]  ;;  %v417_v32 = vld [vmem:[%s2213_s1 + $0x3c0] sm:$0xff]  ;;  %v1543_v35 = vpack.c.bf16 %v400_v25, %v399_v24  ;;  %v1513_v39 = vpack.c.bf16 %v386_v29, %v385_v28 }
  0x2b   : > { %1532 = vmatpush3.bf16.msra.mxu1 %v1531_v51  ;;  %510 = vmatprep.mubr.f32.mxu0 %v235_v54  ;;  %v418_v33 = vld [vmem:[%s2213_s1 + $0x3c8] sm:$0xff]  ;;  %v369_v36 = vld [vmem:[%s2213_s1 + $0x240] sm:$0xff]  ;;  %v264_v42 = vld [vmem:[%s1828_s29 + $0x138] sm:$0xff] }
  0x2c   : > { %615 = vmatprep.mubr.f32.mxu1 %v237_v58  ;;  %1502 = vmatprep.subr.bf16.mxu0 %v1501_v55  ;;  %v254_v34 = vld [vmem:[%s1828_s29 + $0xe8] sm:$0xff]  ;;  %v401_v40 = vld [vmem:[%s2213_s1 + $0x340] sm:$0xff]  ;;  %v1545_v43 = vpack.c.bf16 %v418_v33, %v417_v32  ;;  %v387_v44 = vld [vmem:[%s2213_s1 + $0x2d0] sm:$0xff] }
  0x2d   : > { %511 = vmatmul.mubr.f32.gmra.mrb[2].mxu0 %v234_v62  ;;  %1534 = vmatprep.subr.bf16.mxu1 %v1533_v59  ;;  %v370_v37 = vld [vmem:[%s2213_s1 + $0x248] sm:$0xff]  ;;  %v388_v45 = vld [vmem:[%s2213_s1 + $0x2d8] sm:$0xff]  ;;  %v261_v46 = vld [vmem:[%s1828_s29 + $0x120] sm:$0xff] }
  0x2e   : > { %616 = vmatmul.mubr.f32.gmra.mrb[2].mxu1 %v236_v2  ;;  %1504 = vmatpush3.bf16.msra.mxu0 %v1503_v63  ;;  %v262_v38 = vld [vmem:[%s1828_s29 + $0x128] sm:$0xff]  ;;  %v1515_v47 = vpack.c.bf16 %v370_v37, %v369_v36  ;;  %v419_v48 = vld [vmem:[%s2213_s1 + $0x3d0] sm:$0xff]  ;;  %v420_v49 = vld [vmem:[%s2213_s1 + $0x3d8] sm:$0xff]  ;;  %v1517_v55 = vpack.c.bf16 %v388_v45, %v387_v44 }
  0x2f   : > { %1536 = vmatpush3.bf16.msra.mxu1 %v1535_v3  ;;  %515 = vmatprep.mubr.f32.mxu0 %v244_v6  ;;  %v402_v41 = vld [vmem:[%s2213_s1 + $0x348] sm:$0xff]  ;;  %v263_v50 = vld [vmem:[%s1828_s29 + $0x130] sm:$0xff]  ;;  %v372_v53 = vld [vmem:[%s2213_s1 + $0x258] sm:$0xff]  ;;  %v1549_v59 = vpack.c.bf16 %v420_v49, %v419_v48 }
  0x30   : > { %620 = vmatprep.mubr.f32.mxu1 %v246_v10  ;;  %1506 = vmatprep.subr.bf16.mxu0 %v1505_v7  ;;  %v1547_v51 = vpack.c.bf16 %v402_v41, %v401_v40  ;;  %v371_v52 = vld [vmem:[%s2213_s1 + $0x250] sm:$0xff]  ;;  %v404_v57 = vld [vmem:[%s2213_s1 + $0x358] sm:$0xff]  ;;  %v273_v58 = vld [vmem:[%s1828_s29 + $0x180] sm:$0xff] }
  0x31   : > { %516 = vmatmul.mubr.f32.gmra.mrb[4].mxu0 %v243_v14  ;;  %1538 = vmatprep.subr.bf16.mxu1 %v1537_v11  ;;  %v271_v54 = vld [vmem:[%s1828_s29 + $0x170] sm:$0xff]  ;;  %v389_v60 = vld [vmem:[%s2213_s1 + $0x2e0] sm:$0xff]  ;;  %v390_v61 = vld [vmem:[%s2213_s1 + $0x2e8] sm:$0xff]  ;;  %v1519_v63 = vpack.c.bf16 %v372_v53, %v371_v52 }
  0x32   : > { %621 = vmatmul.mubr.f32.gmra.mrb[4].mxu1 %v245_v18  ;;  %1508 = vmatpush3.bf16.msra.mxu0 %v1507_v15  ;;  %v403_v56 = vld [vmem:[%s2213_s1 + $0x350] sm:$0xff]  ;;  %v270_v62 = vld [vmem:[%s1828_s29 + $0x168] sm:$0xff]  ;;  %v421_v0 = vld [vmem:[%s2213_s1 + $0x3e0] sm:$0xff]  ;;  %v1521_v7 = vpack.c.bf16 %v390_v61, %v389_v60 }
  0x33   : > { %1540 = vmatpush3.bf16.msra.mxu1 %v1539_v19  ;;  %520 = vmatprep.mubr.f32.mxu0 %v253_v22  ;;  %v422_v1 = vld [vmem:[%s2213_s1 + $0x3e8] sm:$0xff]  ;;  %v272_v2 = vld [vmem:[%s1828_s29 + $0x178] sm:$0xff]  ;;  %v1551_v3 = vpack.c.bf16 %v404_v57, %v403_v56  ;;  %v373_v4 = vld [vmem:[%s2213_s1 + $0x260] sm:$0xff] }
  0x34   : > { %625 = vmatprep.mubr.f32.mxu1 %v255_v26  ;;  %1510 = vmatprep.subr.bf16.mxu0 %v1509_v23  ;;  %v374_v5 = vld [vmem:[%s2213_s1 + $0x268] sm:$0xff]  ;;  %v280_v6 = vld [vmem:[%s1828_s29 + $0x1b8] sm:$0xff]  ;;  %v405_v8 = vld [vmem:[%s2213_s1 + $0x360] sm:$0xff]  ;;  %v1553_v11 = vpack.c.bf16 %v422_v1, %v421_v0 }
  0x35   : > { %521 = vmatmul.mubr.f32.gmra.mrb[6].mxu0 %v252_v30  ;;  %1542 = vmatprep.subr.bf16.mxu1 %v1541_v27  ;;  %v406_v9 = vld [vmem:[%s2213_s1 + $0x368] sm:$0xff]  ;;  %v391_v12 = vld [vmem:[%s2213_s1 + $0x2f0] sm:$0xff]  ;;  %v392_v13 = vld [vmem:[%s2213_s1 + $0x2f8] sm:$0xff]  ;;  %v1523_v15 = vpack.c.bf16 %v374_v5, %v373_v4 }
  0x36   : > { %626 = vmatmul.mubr.f32.gmra.mrb[6].mxu1 %v254_v34  ;;  %1512 = vmatpush3.bf16.msra.mxu0 %v1511_v31  ;;  %v282_v10 = vld [vmem:[%s1828_s29 + $0x1c8] sm:$0xff]  ;;  %v279_v14 = vld [vmem:[%s1828_s29 + $0x1b0] sm:$0xff]  ;;  %v424_v17 = vld [vmem:[%s2213_s1 + $0x3f8] sm:$0xff]  ;;  %v1555_v19 = vpack.c.bf16 %v406_v9, %v405_v8  ;;  %v1525_v23 = vpack.c.bf16 %v392_v13, %v391_v12 }
  0x37   : > { %1544 = vmatpush3.bf16.msra.mxu1 %v1543_v35  ;;  %525 = vmatprep.mubr.f32.mxu0 %v262_v38  ;;  %v423_v16 = vld [vmem:[%s2213_s1 + $0x3f0] sm:$0xff]  ;;  %v281_v18 = vld [vmem:[%s1828_s29 + $0x1c0] sm:$0xff]  ;;  %v376_v21 = vld [vmem:[%s2213_s1 + $0x278] sm:$0xff] }
  0x38   : > { %630 = vmatprep.mubr.f32.mxu1 %v264_v42  ;;  %1514 = vmatprep.subr.bf16.mxu0 %v1513_v39  ;;  %v375_v20 = vld [vmem:[%s2213_s1 + $0x270] sm:$0xff]  ;;  %v289_v22 = vld [vmem:[%s1828_s29 + $0x200] sm:$0xff]  ;;  %v408_v25 = vld [vmem:[%s2213_s1 + $0x378] sm:$0xff]  ;;  %v1557_v27 = vpack.c.bf16 %v424_v17, %v423_v16 }
  0x39   : > { %526 = vmatmul.mubr.f32.gmra.mrb[8].mxu0 %v261_v46  ;;  %1546 = vmatprep.subr.bf16.mxu1 %v1545_v43  ;;  %v407_v24 = vld [vmem:[%s2213_s1 + $0x370] sm:$0xff]  ;;  %v425_v28 = vld [vmem:[%s2213_s1 + $0x400] sm:$0xff]  ;;  %v426_v29 = vld [vmem:[%s2213_s1 + $0x408] sm:$0xff]  ;;  %v1527_v31 = vpack.c.bf16 %v376_v21, %v375_v20 }
  0x3a   : > { %631 = vmatmul.mubr.f32.gmra.mrb[8].mxu1 %v263_v50  ;;  %1516 = vmatpush3.bf16.msra.mxu0 %v1515_v47  ;;  %v291_v26 = vld [vmem:[%s1828_s29 + $0x210] sm:$0xff]  ;;  %v288_v30 = vld [vmem:[%s1828_s29 + $0x1f8] sm:$0xff]  ;;  %v290_v32 = vld [vmem:[%s1828_s29 + $0x208] sm:$0xff]  ;;  %v1559_v33 = vpack.c.bf16 %v408_v25, %v407_v24  ;;  %v1561_v35 = vpack.c.bf16 %v426_v29, %v425_v28 }
  0x3b   : > { %1548 = vmatpush3.bf16.msra.mxu1 %v1547_v51  ;;  %530 = vmatprep.mubr.f32.mxu0 %v271_v54  ;;  %v230_v34 = vld [vmem:[%s1828_s29 + $0x28] sm:$0xff]  ;;  %v232_v36 = vld [vmem:[%s1828_s29 + $0x38] sm:$0xff]  ;;  %v427_v37 = vld [vmem:[%s2213_s1 + $0x410] sm:$0xff] }
  0x3c   : > { %635 = vmatprep.mubr.f32.mxu1 %v273_v58  ;;  %1518 = vmatprep.subr.bf16.mxu0 %v1517_v55  ;;  %v428_v38 = vld [vmem:[%s2213_s1 + $0x418] sm:$0xff]  ;;  %v229_v39 = vld [vmem:[%s1828_s29 + $0x20] sm:$0xff]  ;;  %v231_v40 = vld [vmem:[%s1828_s29 + $0x30] sm:$0xff] }
  0x3d   : > { %531 = vmatmul.mubr.f32.gmra.mrb[10].mxu0 %v270_v62  ;;  %1550 = vmatprep.subr.bf16.mxu1 %v1549_v59  ;;  %v239_v41 = vld [vmem:[%s1828_s29 + $0x70] sm:$0xff]  ;;  %v1565_v42 = vpack.c.bf16 %v428_v38, %v427_v37  ;;  %v241_v43 = vld [vmem:[%s1828_s29 + $0x80] sm:$0xff]  ;;  %v430_v45 = vld [vmem:[%s2213_s1 + $0x428] sm:$0xff] }
  0x3e   : > { %636 = vmatmul.mubr.f32.gmra.mrb[10].mxu1 %v272_v2  ;;  %1520 = vmatpush3.bf16.msra.mxu0 %v1519_v63  ;;  %v429_v44 = vld [vmem:[%s2213_s1 + $0x420] sm:$0xff]  ;;  %v238_v46 = vld [vmem:[%s1828_s29 + $0x68] sm:$0xff]  ;;  %v240_v47 = vld [vmem:[%s1828_s29 + $0x78] sm:$0xff] }
  0x3f   : > { %1552 = vmatpush3.bf16.msra.mxu1 %v1551_v3  ;;  %535 = vmatprep.mubr.f32.mxu0 %v280_v6  ;;  %v248_v48 = vld [vmem:[%s1828_s29 + $0xb8] sm:$0xff]  ;;  %v1569_v49 = vpack.c.bf16 %v430_v45, %v429_v44  ;;  %v250_v50 = vld [vmem:[%s1828_s29 + $0xc8] sm:$0xff]  ;;  %v431_v51 = vld [vmem:[%s2213_s1 + $0x430] sm:$0xff] }
  0x40   : > { %640 = vmatprep.mubr.f32.mxu1 %v282_v10  ;;  %1522 = vmatprep.subr.bf16.mxu0 %v1521_v7  ;;  %v432_v52 = vld [vmem:[%s2213_s1 + $0x438] sm:$0xff]  ;;  %v247_v53 = vld [vmem:[%s1828_s29 + $0xb0] sm:$0xff]  ;;  %v249_v54 = vld [vmem:[%s1828_s29 + $0xc0] sm:$0xff] }
  0x41   : > { %536 = vmatmul.mubr.f32.gmra.mrb[12].mxu0 %v279_v14  ;;  %1554 = vmatprep.subr.bf16.mxu1 %v1553_v11  ;;  %v257_v55 = vld [vmem:[%s1828_s29 + $0x100] sm:$0xff]  ;;  %v1573_v56 = vpack.c.bf16 %v432_v52, %v431_v51  ;;  %v259_v57 = vld [vmem:[%s1828_s29 + $0x110] sm:$0xff]  ;;  %v434_v59 = vld [vmem:[%s2213_s1 + $0x448] sm:$0xff] }
  0x42   : > { %641 = vmatmul.mubr.f32.gmra.mrb[12].mxu1 %v281_v18  ;;  %1524 = vmatpush3.bf16.msra.mxu0 %v1523_v15  ;;  %v433_v58 = vld [vmem:[%s2213_s1 + $0x440] sm:$0xff]  ;;  %v256_v60 = vld [vmem:[%s1828_s29 + $0xf8] sm:$0xff]  ;;  %v258_v61 = vld [vmem:[%s1828_s29 + $0x108] sm:$0xff] }
  0x43   : > { %1556 = vmatpush3.bf16.msra.mxu1 %v1555_v19  ;;  %540 = vmatprep.mubr.f32.mxu0 %v289_v22  ;;  %v266_v62 = vld [vmem:[%s1828_s29 + $0x148] sm:$0xff]  ;;  %v1577_v63 = vpack.c.bf16 %v434_v59, %v433_v58  ;;  %v268_v0 = vld [vmem:[%s1828_s29 + $0x158] sm:$0xff]  ;;  %v435_v1 = vld [vmem:[%s2213_s1 + $0x450] sm:$0xff] }
  0x44   : > { %645 = vmatprep.mubr.f32.mxu1 %v291_v26  ;;  %1526 = vmatprep.subr.bf16.mxu0 %v1525_v23  ;;  %v436_v2 = vld [vmem:[%s2213_s1 + $0x458] sm:$0xff]  ;;  %v265_v3 = vld [vmem:[%s1828_s29 + $0x140] sm:$0xff]  ;;  %v267_v4 = vld [vmem:[%s1828_s29 + $0x150] sm:$0xff] }
  0x45   : > { %541 = vmatmul.mubr.f32.gmra.mrb[14].mxu0 %v288_v30  ;;  %1558 = vmatprep.subr.bf16.mxu1 %v1557_v27  ;;  %v275_v5 = vld [vmem:[%s1828_s29 + $0x190] sm:$0xff]  ;;  %v1581_v6 = vpack.c.bf16 %v436_v2, %v435_v1  ;;  %v277_v7 = vld [vmem:[%s1828_s29 + $0x1a0] sm:$0xff]  ;;  %v438_v9 = vld [vmem:[%s2213_s1 + $0x468] sm:$0xff] }
  0x46   : > { %646 = vmatmul.mubr.f32.gmra.mrb[14].mxu1 %v290_v32  ;;  %1528 = vmatpush3.bf16.msra.mxu0 %v1527_v31  ;;  %v437_v8 = vld [vmem:[%s2213_s1 + $0x460] sm:$0xff]  ;;  %v274_v10 = vld [vmem:[%s1828_s29 + $0x188] sm:$0xff]  ;;  %v276_v11 = vld [vmem:[%s1828_s29 + $0x198] sm:$0xff] }
  0x47   : > { %1560 = vmatpush3.bf16.msra.mxu1 %v1559_v33  ;;  %715 = vmatprep.mubr.f32.mxu0 %v230_v34  ;;  %v284_v12 = vld [vmem:[%s1828_s29 + $0x1d8] sm:$0xff]  ;;  %v1585_v13 = vpack.c.bf16 %v438_v9, %v437_v8  ;;  %v286_v14 = vld [vmem:[%s1828_s29 + $0x1e8] sm:$0xff]  ;;  %v439_v15 = vld [vmem:[%s2213_s1 + $0x470] sm:$0xff] }
  0x48   : > { %820 = vmatprep.mubr.f32.mxu1 %v232_v36  ;;  %1562 = vmatprep.subr.bf16.mxu0 %v1561_v35  ;;  %v440_v16 = vld [vmem:[%s2213_s1 + $0x478] sm:$0xff]  ;;  %v283_v17 = vld [vmem:[%s1828_s29 + $0x1d0] sm:$0xff]  ;;  %v285_v18 = vld [vmem:[%s1828_s29 + $0x1e0] sm:$0xff] }
  0x49   : > { %716 = vmatmul.mubr.f32.vlgmr.msra.gmra.mrb[16].mxu0 %v229_v39  ;;  %1593 = vmatprep.subr.bf16.mxu1 %v1561_v35  ;;  %v293_v19 = vld [vmem:[%s1828_s29 + $0x220] sm:$0xff]  ;;  %v1589_v20 = vpack.c.bf16 %v440_v16, %v439_v15  ;;  %v295_v21 = vld [vmem:[%s1828_s29 + $0x230] sm:$0xff]  ;;  %v292_v22 = vld [vmem:[%s1828_s29 + $0x218] sm:$0xff] }
  0x4a   : > { %821 = vmatmul.mubr.f32.vlgmr.msra.gmra.mrb[16].mxu1 %v231_v40  ;;  %1564 = vmatpush3.bf16.msra.mxu0 %v1561_v35  ;;  %v294_v23 = vld [vmem:[%s1828_s29 + $0x228] sm:$0xff]  ;;  %v233_v24 = vld [vmem:[%s1828_s29 + $0x40] sm:$0xff]  ;;  %v251_v28 = vld [vmem:[%s1828_s29 + $0xd0] sm:$0xff] }
  0x4b   : > { %1601 = vmatpush3.bf16.msra.mxu1 %v1561_v35  ;;  %720 = vmatprep.mubr.f32.mxu0 %v239_v41  ;;  %v269_v25 = vld [vmem:[%s1828_s29 + $0x160] sm:$0xff]  ;;  %v242_v26 = vld [vmem:[%s1828_s29 + $0x88] sm:$0xff]  ;;  %v287_v29 = vld [vmem:[%s1828_s29 + $0x1f0] sm:$0xff] }
  0x4c   : > { %825 = vmatprep.mubr.f32.mxu1 %v241_v43  ;;  %1566 = vmatprep.subr.bf16.mxu0 %v1565_v42  ;;  %v278_v27 = vld [vmem:[%s1828_s29 + $0x1a8] sm:$0xff]  ;;  %v260_v30 = vld [vmem:[%s1828_s29 + $0x118] sm:$0xff] }
  0x4d   : > { %721 = vmatmul.mubr.f32.gmra.mrb[18].mxu0 %v238_v46  ;;  %1594 = vmatprep.subr.bf16.mxu1 %v1565_v42  ;;  %v296_v31 = vld [vmem:[%s1828_s29 + $0x238] sm:$0xff]  ;;  %s1136_s29 = sshll.u32 %s2219_s17, 3  ;;  %s1137_s17 = sshll.u32 %s2221_s16, 3 }
  0x4e   : > { %826 = vmatmul.mubr.f32.gmra.mrb[18].mxu1 %v240_v47  ;;  %1568 = vmatpush3.bf16.msra.mxu0 %v1565_v42  ;;  %s2191_s10 = scalar_lea.vmem %s2214_s2, %s1136_s29  ;;  %s220_s24 = scalar_lea.vmem %s2215_s3, %s1137_s17 }
  0x4f   : > { %1602 = vmatpush3.bf16.msra.mxu1 %v1565_v42  ;;  %725 = vmatprep.mubr.f32.mxu0 %v248_v48  ;;  %s224_s27 = scalar_lea.vmem %s2216_s4, %s1137_s17 }
  0x50   : > { %830 = vmatprep.mubr.f32.mxu1 %v250_v50  ;;  %1570 = vmatprep.subr.bf16.mxu0 %v1569_v49 }
  0x51   : > { %726 = vmatmul.mubr.f32.gmra.mrb[20].mxu0 %v247_v53  ;;  %1595 = vmatprep.subr.bf16.mxu1 %v1569_v49 }
  0x52   : > { %831 = vmatmul.mubr.f32.gmra.mrb[20].mxu1 %v249_v54  ;;  %1572 = vmatpush3.bf16.msra.mxu0 %v1569_v49 }
  0x53   : > { %1603 = vmatpush3.bf16.msra.mxu1 %v1569_v49  ;;  %730 = vmatprep.mubr.f32.mxu0 %v257_v55 }
  0x54   : > { %835 = vmatprep.mubr.f32.mxu1 %v259_v57  ;;  %1574 = vmatprep.subr.bf16.mxu0 %v1573_v56 }
  0x55   : > { %731 = vmatmul.mubr.f32.gmra.mrb[22].mxu0 %v256_v60  ;;  %1596 = vmatprep.subr.bf16.mxu1 %v1573_v56 }
  0x56   : > { %836 = vmatmul.mubr.f32.gmra.mrb[22].mxu1 %v258_v61  ;;  %1576 = vmatpush3.bf16.msra.mxu0 %v1573_v56 }
  0x57   : > { %1604 = vmatpush3.bf16.msra.mxu1 %v1573_v56  ;;  %735 = vmatprep.mubr.f32.mxu0 %v266_v62 }
  0x58   : > { %840 = vmatprep.mubr.f32.mxu1 %v268_v0  ;;  %1578 = vmatprep.subr.bf16.mxu0 %v1577_v63 }
  0x59   : > { %736 = vmatmul.mubr.f32.gmra.mrb[24].mxu0 %v265_v3  ;;  %1597 = vmatprep.subr.bf16.mxu1 %v1577_v63 }
  0x5a   : > { %841 = vmatmul.mubr.f32.gmra.mrb[24].mxu1 %v267_v4  ;;  %1580 = vmatpush3.bf16.msra.mxu0 %v1577_v63 }
  0x5b   : > { %1605 = vmatpush3.bf16.msra.mxu1 %v1577_v63  ;;  %740 = vmatprep.mubr.f32.mxu0 %v275_v5 }
  0x5c   : > { %845 = vmatprep.mubr.f32.mxu1 %v277_v7  ;;  %1582 = vmatprep.subr.bf16.mxu0 %v1581_v6 }
  0x5d   : > { %741 = vmatmul.mubr.f32.gmra.mrb[26].mxu0 %v274_v10  ;;  %1598 = vmatprep.subr.bf16.mxu1 %v1581_v6 }
  0x5e   : > { %846 = vmatmul.mubr.f32.gmra.mrb[26].mxu1 %v276_v11  ;;  %1584 = vmatpush3.bf16.msra.mxu0 %v1581_v6 }
  0x5f   : > { %1606 = vmatpush3.bf16.msra.mxu1 %v1581_v6  ;;  %745 = vmatprep.mubr.f32.mxu0 %v284_v12 }
  0x60   : > { %850 = vmatprep.mubr.f32.mxu1 %v286_v14  ;;  %1586 = vmatprep.subr.bf16.mxu0 %v1585_v13 }
  0x61   : > { %746 = vmatmul.mubr.f32.gmra.mrb[28].mxu0 %v283_v17  ;;  %1599 = vmatprep.subr.bf16.mxu1 %v1585_v13 }
  0x62   : > { %851 = vmatmul.mubr.f32.gmra.mrb[28].mxu1 %v285_v18  ;;  %1588 = vmatpush3.bf16.msra.mxu0 %v1585_v13 }
  0x63   : > { %1607 = vmatpush3.bf16.msra.mxu1 %v1585_v13  ;;  %750 = vmatprep.mubr.f32.mxu0 %v293_v19 }
  0x64   : > { %855 = vmatprep.mubr.f32.mxu1 %v295_v21  ;;  %1590 = vmatprep.subr.bf16.mxu0 %v1589_v20 }
  0x65   : > { %751 = vmatmul.mubr.f32.gmra.mrb[30].mxu0 %v292_v22  ;;  %1600 = vmatprep.subr.bf16.mxu1 %v1589_v20 }
  0x66   : > { %856 = vmatmul.mubr.f32.gmra.mrb[30].mxu1 %v294_v23  ;;  %1592 = vmatpush3.bf16.msra.mxu0 %v1589_v20 }
  0x67   : > { %1608 = vmatpush3.bf16.msra.mxu1 %v1589_v20  ;;  %1421 = vmatprep.mubr.f32.mxu0 %v233_v24 }
  0x68   : > { %1427 = vmatprep.mubr.f32.mxu1 %v269_v25 }
  0x69   : > { %1422 = vmatmul.mubr.f32.vlgmr.msra.gmra.mrb[32].mxu0 %v242_v26 }
  0x6a   : > { %1428 = vmatmul.mubr.f32.vlgmr.msra.gmra.mrb[32].mxu1 %v278_v27  ;;  %1424 = vmatprep.mubr.f32.mxu0 %v251_v28 }
  0x6b   : > { %1430 = vmatprep.mubr.f32.mxu1 %v287_v29 }
  0x6d   : > { %1425 = vmatmul.mubr.f32.gmra.mrb[34].mxu0 %v260_v30 }
  0x6e   : > { %1431 = vmatmul.mubr.f32.gmra.mrb[34].mxu1 %v296_v31 }
  0xfc   : > { %v1173_v32 = vpop.f32.mrb[0].mxu0 }
  0xfd   : > { %v1229_v33 = vpop.f32.mrb[0].mxu1  ;;  %v1174_v34 = vpop.f32.mrb[1].mxu0 }
  0xfe   : > { %v1175_v35 = vadd.f32 %v1174_v34, %v1173_v32  ;;  %v1230_v36 = vpop.f32.mrb[1].mxu1 }
  0xff   : > { %v1231_v37 = vadd.f32 %v1230_v36, %v1229_v33 }
 0x100   : > { %v1176_v38 = vpop.f32.mrb[2].mxu0 }
 0x101   : > { %v613_v39 = vadd.f32 %v1231_v37, %v1175_v35  ;;  %v1232_v40 = vpop.f32.mrb[2].mxu1  ;;  %v1177_v41 = vpop.f32.mrb[3].mxu0 }
 0x102   : > { %v1178_v42 = vadd.f32 %v1177_v41, %v1176_v38  ;;  %v1233_v43 = vpop.f32.mrb[3].mxu1 }
 0x103   : > { %v1234_v44 = vadd.f32 %v1233_v43, %v1232_v40 }
 0x104   : > { %v1179_v45 = vpop.f32.mrb[4].mxu0 }
 0x105   : > { %v618_v46 = vadd.f32 %v1234_v44, %v1178_v42  ;;  %v1235_v47 = vpop.f32.mrb[4].mxu1  ;;  %v1180_v48 = vpop.f32.mrb[5].mxu0 }
 0x106   : > { %v1181_v49 = vadd.f32 %v1180_v48, %v1179_v45  ;;  %v1236_v50 = vpop.f32.mrb[5].mxu1 }
 0x107   : > { %v1237_v51 = vadd.f32 %v1236_v50, %v1235_v47 }
 0x108   : > { %v1182_v52 = vpop.f32.mrb[6].mxu0 }
 0x109   : > { %v623_v53 = vadd.f32 %v1237_v51, %v1181_v49  ;;  %v1238_v54 = vpop.f32.mrb[6].mxu1  ;;  %v1183_v55 = vpop.f32.mrb[7].mxu0 }
 0x10a   : > { %v1184_v56 = vadd.f32 %v1183_v55, %v1182_v52  ;;  %v1239_v57 = vpop.f32.mrb[7].mxu1 }
 0x10b   : > { %v1240_v58 = vadd.f32 %v1239_v57, %v1238_v54 }
 0x10c   : > { %v1185_v59 = vpop.f32.mrb[8].mxu0 }
 0x10d   : > { %v628_v60 = vadd.f32 %v1240_v58, %v1184_v56  ;;  %v1241_v61 = vpop.f32.mrb[8].mxu1  ;;  %v1186_v62 = vpop.f32.mrb[9].mxu0 }
 0x10e   : > { %v1187_v63 = vadd.f32 %v1186_v62, %v1185_v59  ;;  %v1242_v0 = vpop.f32.mrb[9].mxu1 }
 0x10f   : > { %v1243_v1 = vadd.f32 %v1242_v0, %v1241_v61 }
 0x110   : > { %v1188_v2 = vpop.f32.mrb[10].mxu0 }
 0x111   : > { %v633_v3 = vadd.f32 %v1243_v1, %v1187_v63  ;;  %v1244_v4 = vpop.f32.mrb[10].mxu1  ;;  %v1189_v5 = vpop.f32.mrb[11].mxu0 }
 0x112   : > { %v1190_v6 = vadd.f32 %v1189_v5, %v1188_v2  ;;  %v1245_v7 = vpop.f32.mrb[11].mxu1 }
 0x113   : > { %v1246_v8 = vadd.f32 %v1245_v7, %v1244_v4 }
 0x114   : > { %v1191_v9 = vpop.f32.mrb[12].mxu0 }
 0x115   : > { %v638_v10 = vadd.f32 %v1246_v8, %v1190_v6  ;;  %v1247_v11 = vpop.f32.mrb[12].mxu1  ;;  %v1192_v12 = vpop.f32.mrb[13].mxu0 }
 0x116   : > { %v1193_v13 = vadd.f32 %v1192_v12, %v1191_v9  ;;  %v1248_v14 = vpop.f32.mrb[13].mxu1 }
 0x117   : > { %v1249_v15 = vadd.f32 %v1248_v14, %v1247_v11 }
 0x118   : > { %v1194_v16 = vpop.f32.mrb[14].mxu0 }
 0x119   : > { %v643_v17 = vadd.f32 %v1249_v15, %v1193_v13  ;;  %v1250_v18 = vpop.f32.mrb[14].mxu1  ;;  %v1195_v19 = vpop.f32.mrb[15].mxu0 }
 0x11a   : > { %v1196_v20 = vadd.f32 %v1195_v19, %v1194_v16  ;;  %v1251_v21 = vpop.f32.mrb[15].mxu1 }
 0x11b   : > { %v1252_v22 = vadd.f32 %v1251_v21, %v1250_v18 }
 0x11c   : > { %v1285_v23 = vpop.f32.mrb[16].mxu0 }
 0x11d   : > { %v2184_v24 = vadd.f32 %v1252_v22, %v1196_v20  ;;  %v1286_v25 = vpop.f32.mrb[17].mxu0  ;;  %v1341_v26 = vpop.f32.mrb[16].mxu1 }
 0x11e   : > { %v1287_v27 = vadd.f32 %v1286_v25, %v1285_v23  ;;  %v1342_v28 = vpop.f32.mrb[17].mxu1 }
 0x11f   : > { %v1343_v29 = vadd.f32 %v1342_v28, %v1341_v26 }
 0x120   : > { %v718_v30 = vadd.f32 %v1287_v27, %v613_v39  ;;  %v1288_v31 = vpop.f32.mrb[18].mxu0 }
 0x121   : > { %v1289_v32 = vpop.f32.mrb[19].mxu0  ;;  %v1344_v33 = vpop.f32.mrb[18].mxu1 }
 0x122   : > { %v1290_v34 = vadd.f32 %v1289_v32, %v1288_v31  ;;  %v1345_v35 = vpop.f32.mrb[19].mxu1  ;;  %v823_v36 = vadd.f32 %v1343_v29, %v718_v30 }
 0x123   : > { %v1346_v37 = vadd.f32 %v1345_v35, %v1344_v33 }
 0x124   : > { %v723_v38 = vadd.f32 %v1290_v34, %v618_v46  ;;  %v1291_v40 = vpop.f32.mrb[20].mxu0 }
 0x125   : > { %v1292_v41 = vpop.f32.mrb[21].mxu0  ;;  %v1347_v42 = vpop.f32.mrb[20].mxu1 }
 0x126   : > { %v1293_v43 = vadd.f32 %v1292_v41, %v1291_v40  ;;  %v1348_v44 = vpop.f32.mrb[21].mxu1  ;;  %v828_v45 = vadd.f32 %v1346_v37, %v723_v38 }
 0x127   : > { %v1349_v47 = vadd.f32 %v1348_v44, %v1347_v42 }
 0x128   : > { %v728_v48 = vadd.f32 %v1293_v43, %v623_v53  ;;  %v1294_v49 = vpop.f32.mrb[22].mxu0 }
 0x129   : > { %v1295_v50 = vpop.f32.mrb[23].mxu0  ;;  %v1350_v51 = vpop.f32.mrb[22].mxu1 }
 0x12a   : > { %v1296_v39 = vadd.f32 %v1295_v50, %v1294_v49  ;;  %v1351_v52 = vpop.f32.mrb[23].mxu1  ;;  %v833_v54 = vadd.f32 %v1349_v47, %v728_v48 }
 0x12b   : > { %v1352_v55 = vadd.f32 %v1351_v52, %v1350_v51 }
 0x12c   : > { %v733_v56 = vadd.f32 %v1296_v39, %v628_v60  ;;  %v1297_v57 = vpop.f32.mrb[24].mxu0 }
 0x12d   : > { %v1298_v58 = vpop.f32.mrb[25].mxu0  ;;  %v1353_v59 = vpop.f32.mrb[24].mxu1 }
 0x12e   : > { %v1299_v46 = vadd.f32 %v1298_v58, %v1297_v57  ;;  %v1354_v61 = vpop.f32.mrb[25].mxu1  ;;  %v838_v62 = vadd.f32 %v1352_v55, %v733_v56 }
 0x12f   : > { %v1355_v63 = vadd.f32 %v1354_v61, %v1353_v59 }
 0x130   : > { %v738_v0 = vadd.f32 %v1299_v46, %v633_v3  ;;  %v1300_v1 = vpop.f32.mrb[26].mxu0 }
 0x131   : > { %v1301_v2 = vpop.f32.mrb[27].mxu0  ;;  %v1356_v4 = vpop.f32.mrb[26].mxu1 }
 0x132   : > { %v1302_v53 = vadd.f32 %v1301_v2, %v1300_v1  ;;  %v1357_v5 = vpop.f32.mrb[27].mxu1  ;;  %v843_v6 = vadd.f32 %v1355_v63, %v738_v0 }
 0x133   : > { %v1358_v7 = vadd.f32 %v1357_v5, %v1356_v4 }
 0x134   : > { %v743_v8 = vadd.f32 %v1302_v53, %v638_v10  ;;  %v1303_v9 = vpop.f32.mrb[28].mxu0 }
 0x135   : > { %v1304_v11 = vpop.f32.mrb[29].mxu0  ;;  %v1359_v60 = vpop.f32.mrb[28].mxu1 }
 0x136   : > { %v1305_v12 = vadd.f32 %v1304_v11, %v1303_v9  ;;  %v1360_v13 = vpop.f32.mrb[29].mxu1  ;;  %v848_v14 = vadd.f32 %v1358_v7, %v743_v8 }
 0x137   : > { %v1361_v15 = vadd.f32 %v1360_v13, %v1359_v60 }
 0x138   : > { %v748_v16 = vadd.f32 %v1305_v12, %v643_v17  ;;  %v1306_v18 = vpop.f32.mrb[30].mxu0 }
 0x139   : > { %v1307_v19 = vpop.f32.mrb[31].mxu0  ;;  %v1362_v3 = vpop.f32.mrb[30].mxu1 }
 0x13a   : > { %v1308_v20 = vadd.f32 %v1307_v19, %v1306_v18  ;;  %v1363_v21 = vpop.f32.mrb[31].mxu1  ;;  %v853_v22 = vadd.f32 %v1361_v15, %v748_v16 }
 0x13b   : > { %v1364_v23 = vadd.f32 %v1363_v21, %v1362_v3 }
 0x13c   : > { %v753_v25 = vadd.f32 %v1308_v20, %v2184_v24  ;;  %v1423_v10 = vpop.f32.mrb[32].mxu0 }
 0x13d   : > { %v933_v17 = vadd.f32 %v1423_v10, %v828_v45  ;;  %v1429_v26 = vpop.f32.mrb[32].mxu1  ;;  %v927_v27 = vpop.f32.mrb[33].mxu0 }
 0x13e   : > { %v953_v28 = vadd.f32 %v1429_v26, %v848_v14  ;;  %v928_v29 = vadd.f32 %v927_v27, %v823_v36  ;;  %v947_v30 = vpop.f32.mrb[33].mxu1  ;;  %v858_v31 = vadd.f32 %v1364_v23, %v753_v25 }
 0x13f   : > { %967 = vst [vmem:[%s2191_s10 + $0x8] sm:$0xff] %v933_v17  ;;  %v989_v24 = vmul.f32 %v933_v17, %v933_v17  ;;  %v948_v32 = vadd.f32 %v947_v30, %v843_v6 }
 0x140   : > { %971 = vst [vmem:[%s2191_s10 + $0x28] sm:$0xff] %v953_v28  ;;  %966 = vst [vmem:[%s2191_s10] sm:$0xff] %v928_v29  ;;  %v974_v33 = vadd.f32 %v933_v17, %v928_v29  ;;  %v988_v34 = vmul.f32 %v928_v29, %v928_v29  ;;  %v1426_v35 = vpop.f32.mrb[34].mxu0  ;;  %v993_v55 = vmul.f32 %v953_v28, %v953_v28 }
 0x141   : > { %970 = vst [vmem:[%s2191_s10 + $0x20] sm:$0xff] %v948_v32  ;;  %v943_v37 = vadd.f32 %v1426_v35, %v838_v62  ;;  %v1432_v38 = vpop.f32.mrb[34].mxu1  ;;  %v937_v40 = vpop.f32.mrb[35].mxu0  ;;  %v992_v51 = vmul.f32 %v948_v32, %v948_v32 }
 0x142   : > { %v996_v41 = vadd.f32 %v989_v24, %v988_v34  ;;  %v963_v36 = vadd.f32 %v1432_v38, %v858_v31  ;;  %v938_v42 = vadd.f32 %v937_v40, %v833_v54  ;;  %v957_v43 = vpop.f32.mrb[35].mxu1 }
 0x143   : > { %969 = vst [vmem:[%s2191_s10 + $0x18] sm:$0xff] %v943_v37  ;;  %v958_v44 = vadd.f32 %v957_v43, %v853_v22  ;;  %v991_v48 = vmul.f32 %v943_v37, %v943_v37 }
 0x144   : > { %973 = vst [vmem:[%s2191_s10 + $0x38] sm:$0xff] %v963_v36  ;;  %968 = vst [vmem:[%s2191_s10 + $0x10] sm:$0xff] %v938_v42  ;;  %v975_v45 = vadd.f32 %v974_v33, %v938_v42  ;;  %v990_v47 = vmul.f32 %v938_v42, %v938_v42  ;;  %v995_v46 = vmul.f32 %v963_v36, %v963_v36 }
 0x145   : > { %972 = vst [vmem:[%s2191_s10 + $0x30] sm:$0xff] %v958_v44  ;;  %v994_v58 = vmul.f32 %v958_v44, %v958_v44 }
 0x146   : > { %v976_v49 = vadd.f32 %v975_v45, %v943_v37  ;;  %v997_v50 = vadd.f32 %v996_v41, %v990_v47 }
 0x148   : > { %v998_v39 = vadd.f32 %v997_v50, %v991_v48  ;;  %v977_v52 = vadd.f32 %v976_v49, %v948_v32 }
 0x14a   : > { %v978_v56 = vadd.f32 %v977_v52, %v953_v28  ;;  %v999_v57 = vadd.f32 %v998_v39, %v992_v51 }
 0x14c   : > { %v979_v54 = vadd.f32 %v978_v56, %v958_v44  ;;  %v1000_v59 = vadd.f32 %v999_v57, %v993_v55 }
 0x14e   : > { %v980_v61 = vadd.f32 %v979_v54, %v963_v36  ;;  %v1001_v62 = vadd.f32 %v1000_v59, %v994_v58 }
 0x150   : > { %v981_v63 = vrot.slane %v980_v61, 4  ;;  %v1002_v0 = vadd.f32 %v1001_v62, %v995_v46 }
 0x152   : > { %v982_v1 = vadd.f32 %v981_v63, %v980_v61  ;;  %v1003_v2 = vrot.slane %v1002_v0, 4 }
 0x154   : > { %v983_v4 = vrot.slane %v982_v1, 2  ;;  %v1004_v53 = vadd.f32 %v1003_v2, %v1002_v0 }
 0x156   : > { %v984_v5 = vadd.f32 %v983_v4, %v982_v1  ;;  %v1005_v6 = vrot.slane %v1004_v53, 2 }
 0x158   : > { %v985_v7 = vrot.slane %v984_v5, 1  ;;  %v1006_v8 = vadd.f32 %v1005_v6, %v1004_v53 }
 0x15a   : > { %v986_v9 = vadd.f32 %v985_v7, %v984_v5  ;;  %v1007_v11 = vrot.slane %v1006_v8, 1 }
 0x15c   : > { %987 = vst [vmem:[%s220_s24] sm:$0xff] %v986_v9  ;;  %v1008_v60 = vadd.f32 %v1007_v11, %v1006_v8 }
 0x15e   : > { %1009 = vst [vmem:[%s224_s27] sm:$0xff] %v1008_v60 }
 0x15f PF: > { %s15_s15 = sadd.s32 1, %s1624_s15  }
 0x160   : > { %p12_p5 = scmp.ge.s32.totalorder %s15_s15, 4  }
 0x162   :  { %14 = sbr.rel (!%p12_p5) target bundleno = 1 (0x1), region = 82 }

</bundles_post_ra>
